<compile_context>
chip_gen: v6e
topology: v6e:2x2x1
jax: 0.10.0
libtpu: 0.0.40
codegen_flags: <defaults>
</compile_context>

<pallas_src>
import jax
import jax.numpy as jnp
from jax.experimental import pallas as pl
from jax.experimental.pallas import tpu as pltpu


# ------------------------------------------------------------------
# Pallas kernel 1: one bidirectional LSTM layer
#   grid=(2,) over directions; time recurrence is an in-kernel fori_loop.
# ------------------------------------------------------------------
def _bilstm_dir_kernel(x_ref, wih_ref, whh_ref, b_ref, out_ref,
                       gx_ref, h_st, c_st):
    d = pl.program_id(0)                  # 0 = forward, 1 = backward
    T = x_ref.shape[0]
    H = whh_ref.shape[0]

    # Batched input projection for all timesteps on the MXU: (T, D) x (D, 4H).
    gx_ref[...] = (jnp.dot(x_ref[...], wih_ref[...],
                           preferred_element_type=jnp.float32)
                   + b_ref[...])

    # Fresh state every grid step (no reliance on cross-step scratch reuse).
    h_st[...] = jnp.zeros_like(h_st)
    c_st[...] = jnp.zeros_like(c_st)

    reverse = d == 1

    def step(s, carry):
        t = jnp.where(reverse, T - 1 - s, s)          # reversed time for bwd dir
        gx = gx_ref[pl.ds(t, 1), :]                   # (1, 4H) precomputed gates_x
        h_prev = h_st[...]
        gates = gx + jnp.dot(h_prev, whh_ref[...],
                             preferred_element_type=jnp.float32)
        # PyTorch gate order: i, f, g, o
        i_g = jax.nn.sigmoid(gates[:, 0 * H:1 * H])
        f_g = jax.nn.sigmoid(gates[:, 1 * H:2 * H])
        g_g = jnp.tanh(gates[:, 2 * H:3 * H])
        o_g = jax.nn.sigmoid(gates[:, 3 * H:4 * H])
        c_new = f_g * c_st[...] + i_g * g_g
        h_new = o_g * jnp.tanh(c_new)
        c_st[...] = c_new
        h_st[...] = h_new
        out_ref[pl.ds(t, 1), :] = h_new               # VMEM write; one HBM DMA at end
        return carry

    jax.lax.fori_loop(0, T, step, 0, unroll=True)


def bilstm_layer(x, layer):
    """Bidirectional LSTM layer: x (T, D) -> (T, 2H) = [h_fwd | h_bwd]."""
    T, D = x.shape
    H = layer["w_hh_f"].shape[1]
    G = 4 * H

    wih_s = jnp.stack([layer["w_ih_f"].T, layer["w_ih_b"].T])          # (2, D, 4H)
    whh_s = jnp.stack([layer["w_hh_f"].T, layer["w_hh_b"].T])          # (2, H, 4H)
    b_s = jnp.stack([(layer["b_ih_f"] + layer["b_hh_f"]).reshape(1, G),
                     (layer["b_ih_b"] + layer["b_hh_b"]).reshape(1, G)])  # (2, 1, 4H)

    out = pl.pallas_call(
        _bilstm_dir_kernel,
        out_shape=jax.ShapeDtypeStruct((2, T, H), jnp.float32),
        grid=(2,),
        in_specs=[
            pl.BlockSpec((T, D), lambda d: (0, 0)),            # shared input
            pl.BlockSpec((None, D, G), lambda d: (d, 0, 0)),   # per-direction W_ih^T
            pl.BlockSpec((None, H, G), lambda d: (d, 0, 0)),   # per-direction W_hh^T
            pl.BlockSpec((None, 1, G), lambda d: (d, 0, 0)),   # per-direction bias
        ],
        out_specs=pl.BlockSpec((None, T, H), lambda d: (d, 0, 0)),
        scratch_shapes=[
            pltpu.VMEM((T, G), jnp.float32),   # gates_x for all timesteps
            pltpu.VMEM((1, H), jnp.float32),   # h state
            pltpu.VMEM((1, H), jnp.float32),   # c state
        ],
        compiler_params=pltpu.CompilerParams(
            dimension_semantics=("parallel",)),   # v7x: one direction per TC
    )(x, wih_s, whh_s, b_s)

    # [h_fwd | h_bwd] per timestep (PyTorch bi-LSTM output layout).
    return jnp.concatenate([out[0], out[1]], axis=1)


# ------------------------------------------------------------------
# Pallas kernel 2: span gather + lin_r head + log_softmax(dim=0)
#   arg_candidates arrive via scalar prefetch (SMEM); the
#   [s, e, s+e, s-e] @ W1^T concat-matmul is folded into
#   s @ W_start + e @ W_end (exactly equivalent algebraically).
# ------------------------------------------------------------------
def _span_head_kernel(cand_ref, feat_ref, ws_ref, we_ref, b1_ref, w2_ref,
                      o_ref, st_ref, en_ref):
    C = st_ref.shape[0]

    def gather(c, carry):
        st_ref[pl.ds(c, 1), :] = feat_ref[pl.ds(cand_ref[c, 0], 1), :]
        en_ref[pl.ds(c, 1), :] = feat_ref[pl.ds(cand_ref[c, 1], 1), :]
        return carry

    jax.lax.fori_loop(0, C, gather, 0, unroll=True)

    h = (jnp.dot(st_ref[...], ws_ref[...], preferred_element_type=jnp.float32)
         + jnp.dot(en_ref[...], we_ref[...], preferred_element_type=jnp.float32)
         + b1_ref[...])
    h = jnp.maximum(h, 0.0)            # ReLU (Dropout(0.3) identity at inference)
    s = jnp.dot(h, w2_ref[...], preferred_element_type=jnp.float32)
    # log_softmax over dim 0 (candidates)
    m = jnp.max(s, axis=0, keepdims=True)
    lse = m + jnp.log(jnp.sum(jnp.exp(s - m), axis=0, keepdims=True))
    o_ref[...] = s - lse


def span_head(lstm_features, arg_candidates, w1, b1, w2):
    T, H2 = lstm_features.shape        # H2 = 2H
    C = arg_candidates.shape[0]
    F2 = w1.shape[0]                   # 4H
    L = w2.shape[0]                    # label_size
    Lp = ((L + 127) // 128) * 128      # lane-dense padded output width

    # Fold the [s, e, s+e, s-e] concat into start/end weight matrices:
    #   span @ W1^T = s@A + e@B + (s+e)@C + (s-e)@D = s@(A+C+D) + e@(B+C-D)
    w1t = w1.T                                         # (8H, 4H)
    a_, b_, c_, d_ = (w1t[0 * H2:1 * H2], w1t[1 * H2:2 * H2],
                      w1t[2 * H2:3 * H2], w1t[3 * H2:4 * H2])
    ws = a_ + c_ + d_                                  # (2H, 4H)
    we = b_ + c_ - d_                                  # (2H, 4H)
    w2p = jnp.zeros((F2, Lp), jnp.float32).at[:, :L].set(w2.T)

    out = pl.pallas_call(
        _span_head_kernel,
        out_shape=jax.ShapeDtypeStruct((C, Lp), jnp.float32),
        grid_spec=pltpu.PrefetchScalarGridSpec(
            num_scalar_prefetch=1,
            grid=(1,),
            in_specs=[
                pl.BlockSpec((T, H2), lambda i, cand: (0, 0)),
                pl.BlockSpec((H2, F2), lambda i, cand: (0, 0)),
                pl.BlockSpec((H2, F2), lambda i, cand: (0, 0)),
                pl.BlockSpec((1, F2), lambda i, cand: (0, 0)),
                pl.BlockSpec((F2, Lp), lambda i, cand: (0, 0)),
            ],
            out_specs=pl.BlockSpec((C, Lp), lambda i, cand: (0, 0)),
            scratch_shapes=[pltpu.VMEM((C, H2), jnp.float32),
                            pltpu.VMEM((C, H2), jnp.float32)],
        ),
        compiler_params=pltpu.CompilerParams(
            dimension_semantics=("arbitrary",)),
    )(arg_candidates.astype(jnp.int32), lstm_features, ws, we,
      b1.reshape(1, -1), w2p)
    return out[:, :L]


# ------------------------------------------------------------------
# Full forward pass (Span_labler.forward, syntax_flag=False)
# ------------------------------------------------------------------
def span_labler_forward(params, word_input, pos_input, dp_input,
                        arg_candidates, gold_pred_idx):
    # ----- get_LSTM_features -----
    target = arg_candidates[gold_pred_idx]
    T = word_input.shape[0]
    idx = jnp.arange(T)
    position_input = ((idx >= target[0]) & (idx <= target[1])).astype(jnp.int32)
    word_e = params["word_emb"][word_input]
    pos_e = params["pos_emb"][pos_input]
    dp_e = params["dp_emb"][dp_input]
    position_e = params["position_emb"][position_input]
    x = jnp.concatenate([word_e, pos_e, dp_e, position_e], axis=1)  # (T, D_in)

    layer_in = x
    for layer in params["lstm"]:
        layer_in = bilstm_layer(layer_in, layer)                    # (T, 2H)
        # TODO(synk): inter-layer LSTM dropout(0.3) skipped (inference semantics)
    lstm_features = layer_in                                        # (T, 2H)

    # ----- get_span_features + argument_prediction (fused in-kernel) -----
    return span_head(lstm_features, arg_candidates,
                     params["w1"], params["b1"], params["w2"])


# ------------------------------------------------------------------
# Deterministic parameter init (shapes from Span_labler.__init__)
# ------------------------------------------------------------------
def init_params(key, *, vocab_size, word_dim, pos_size, pos_dim, dp_size, dp_dim,
                hidden_dim, n_layers, label_size):
    position_dim = 5
    d_in = word_dim + pos_dim + position_dim + dp_dim
    keys = iter(jax.random.split(key, 8 + 8 * n_layers))

    def nrm(shape, scale=0.1):
        return (scale * jax.random.normal(next(keys), shape)).astype(jnp.float32)

    params = {
        "word_emb": nrm((vocab_size, word_dim)),        # stands in for GloVe matrix
        "pos_emb": nrm((pos_size, pos_dim)),
        "dp_emb": nrm((dp_size, dp_dim)),
        "position_emb": nrm((2, position_dim)),
        "lstm": [],
        "w1": nrm((4 * hidden_dim, 8 * hidden_dim)),    # Linear(8H, 4H)
        "b1": nrm((4 * hidden_dim,)),
        "w2": nrm((label_size, 4 * hidden_dim)),        # Linear(4H, L, bias=False)
    }
    in_dim = d_in
    for _ in range(n_layers):
        params["lstm"].append({
            "w_ih_f": nrm((4 * hidden_dim, in_dim)),
            "w_hh_f": nrm((4 * hidden_dim, hidden_dim)),
            "b_ih_f": nrm((4 * hidden_dim,)),
            "b_hh_f": nrm((4 * hidden_dim,)),
            "w_ih_b": nrm((4 * hidden_dim, in_dim)),
            "w_hh_b": nrm((4 * hidden_dim, hidden_dim)),
            "b_ih_b": nrm((4 * hidden_dim,)),
            "b_hh_b": nrm((4 * hidden_dim,)),
        })
        in_dim = 2 * hidden_dim
    return params


if __name__ == "__main__":
    key = jax.random.PRNGKey(0)
    vocab_size, word_dim = 20, 16
    pos_size, pos_dim = 10, 8
    dp_size, dp_dim = 6, 4
    hidden_dim, n_layers = 32, 1
    label_size = 6
    T = 8

    pkey, dkey = jax.random.split(key)
    params = init_params(pkey, vocab_size=vocab_size, word_dim=word_dim,
                         pos_size=pos_size, pos_dim=pos_dim,
                         dp_size=dp_size, dp_dim=dp_dim,
                         hidden_dim=hidden_dim, n_layers=n_layers,
                         label_size=label_size)

    k1, k2, k3 = jax.random.split(dkey, 3)
    word_input = jax.random.randint(k1, (T,), 0, vocab_size)
    pos_input = jax.random.randint(k2, (T,), 0, pos_size)
    dp_input = jax.random.randint(k3, (T,), 0, dp_size)
    arg_candidates = jnp.array([[0, 2], [1, 4], [3, 6], [5, 7]], dtype=jnp.int32)
    gold_pred_idx = 1

    out = span_labler_forward(params, word_input, pos_input, dp_input,
                              arg_candidates, gold_pred_idx)
    jax.block_until_ready(out)
    assert out.shape == (arg_candidates.shape[0], label_size)
    assert out.dtype == jnp.float32
    print("KERNEL_OK")
</pallas_src>

<mosaic_0001>
module attributes {stable_mosaic.version = 11 : i64} {
  func.func @_bilstm_dir_kernel(%arg0: i32, %arg1: memref<8x33xf32, #tpu.memory_space<vmem>>, %arg2: memref<1x33x128xf32, #tpu.memory_space<vmem>>, %arg3: memref<1x32x128xf32, #tpu.memory_space<vmem>>, %arg4: memref<1x1x128xf32, #tpu.memory_space<vmem>>, %arg5: memref<1x8x32xf32, #tpu.memory_space<vmem>>, %arg6: memref<8x128xf32, #tpu.memory_space<vmem>>, %arg7: memref<1x32xf32, #tpu.memory_space<vmem>>, %arg8: memref<1x32xf32, #tpu.memory_space<vmem>>) attributes {dimension_semantics = [#tpu.dimension_semantics<parallel>], iteration_bounds = array<i64: 2>, scalar_prefetch = 0 : i64, scratch_operands = 3 : i64, tpu.core_type = #tpu.core_type<tc>, window_params = [{pipeline_mode = #tpu.pipeline_mode<synchronous>, transform_indices = @transform_0, window_bounds = array<i64: 8, 33>}, {transform_indices = @transform_1, window_bounds = array<i64: 1, 33, 128>}, {transform_indices = @transform_2, window_bounds = array<i64: 1, 32, 128>}, {transform_indices = @transform_3, window_bounds = array<i64: 1, 1, 128>}, {transform_indices = @transform_4, window_bounds = array<i64: 1, 8, 32>}]} {
    %c0 = arith.constant 0 : index
    %c0_0 = arith.constant 0 : index
    %0 = vector.load %arg1[%c0, %c0_0] : memref<8x33xf32, #tpu.memory_space<vmem>>, vector<8x33xf32>
    %c0_1 = arith.constant 0 : index
    %c0_2 = arith.constant 0 : index
    %c0_3 = arith.constant 0 : index
    %1 = vector.load %arg2[%c0_1, %c0_2, %c0_3] : memref<1x33x128xf32, #tpu.memory_space<vmem>>, vector<1x33x128xf32>
    %2 = vector.shape_cast %1 : vector<1x33x128xf32> to vector<33x128xf32>
    %cst = arith.constant dense<0.000000e+00> : vector<8x128xf32>
    %3 = tpu.matmul %0, %2, %cst {dimension_numbers = #tpu.dot_dimension_numbers<[1], [0], [0], [1], [0, 0, 1, 1], [], []>} : vector<8x33xf32>, vector<33x128xf32>, vector<8x128xf32> -> vector<8x128xf32>
    %c0_4 = arith.constant 0 : index
    %c0_5 = arith.constant 0 : index
    %c0_6 = arith.constant 0 : index
    %4 = vector.load %arg4[%c0_4, %c0_5, %c0_6] : memref<1x1x128xf32, #tpu.memory_space<vmem>>, vector<1x1x128xf32>
    %5 = vector.shape_cast %4 : vector<1x1x128xf32> to vector<1x128xf32>
    %6 = vector.broadcast %5 : vector<1x128xf32> to vector<8x128xf32>
    %7 = arith.addf %3, %6 : vector<8x128xf32>
    %c0_7 = arith.constant 0 : index
    %c0_8 = arith.constant 0 : index
    %8 = vector.load %arg6[%c0_7, %c0_8] : memref<8x128xf32, #tpu.memory_space<vmem>>, vector<8x128xf32>
    tpu.vector_store %arg6[%c0_7, %c0_8], %7 {strides = array<i32>} : memref<8x128xf32, #tpu.memory_space<vmem>>, vector<8x128xf32>,
    %cst_9 = arith.constant 0.000000e+00 : f32
    %9 = vector.broadcast %cst_9 : f32 to vector<1x32xf32>
    %c0_10 = arith.constant 0 : index
    %c0_11 = arith.constant 0 : index
    %10 = vector.load %arg7[%c0_10, %c0_11] : memref<1x32xf32, #tpu.memory_space<vmem>>, vector<1x32xf32>
    tpu.vector_store %arg7[%c0_10, %c0_11], %9 {strides = array<i32>} : memref<1x32xf32, #tpu.memory_space<vmem>>, vector<1x32xf32>,
    %cst_12 = arith.constant 0.000000e+00 : f32
    %11 = vector.broadcast %cst_12 : f32 to vector<1x32xf32>
    %c0_13 = arith.constant 0 : index
    %c0_14 = arith.constant 0 : index
    %12 = vector.load %arg8[%c0_13, %c0_14] : memref<1x32xf32, #tpu.memory_space<vmem>>, vector<1x32xf32>
    tpu.vector_store %arg8[%c0_13, %c0_14], %11 {strides = array<i32>} : memref<1x32xf32, #tpu.memory_space<vmem>>, vector<1x32xf32>,
    %c1_i32 = arith.constant 1 : i32
    %13 = arith.cmpi eq, %arg0, %c1_i32 : i32
    %c0_i32 = arith.constant 0 : i32
    %c7_i32 = arith.constant 7 : i32
    %14 = arith.subi %c7_i32, %c0_i32 : i32
    %15 = arith.select %13, %14, %c0_i32 : i32
    %16 = arith.index_cast %15 : i32 to index
    %c0_15 = arith.constant 0 : index
    %17 = vector.load %arg6[%16, %c0_15] : memref<8x128xf32, #tpu.memory_space<vmem>>, vector<1x128xf32>
    %c0_16 = arith.constant 0 : index
    %c0_17 = arith.constant 0 : index
    %18 = vector.load %arg7[%c0_16, %c0_17] : memref<1x32xf32, #tpu.memory_space<vmem>>, vector<1x32xf32>
    %c0_18 = arith.constant 0 : index
    %c0_19 = arith.constant 0 : index
    %c0_20 = arith.constant 0 : index
    %19 = vector.load %arg3[%c0_18, %c0_19, %c0_20] : memref<1x32x128xf32, #tpu.memory_space<vmem>>, vector<1x32x128xf32>
    %20 = vector.shape_cast %19 : vector<1x32x128xf32> to vector<32x128xf32>
    %cst_21 = arith.constant dense<0.000000e+00> : vector<1x128xf32>
    %21 = tpu.matmul %18, %20, %cst_21 {dimension_numbers = #tpu.dot_dimension_numbers<[1], [0], [0], [1], [0, 0, 1, 1], [], []>} : vector<1x32xf32>, vector<32x128xf32>, vector<1x128xf32> -> vector<1x128xf32>
    %22 = arith.addf %17, %21 : vector<1x128xf32>
    %23 = vector.extract_strided_slice %22 {offsets = [0, 0], sizes = [1, 32], strides = [1, 1]} : vector<1x128xf32> to vector<1x32xf32>
    %24 = arith.negf %23 : vector<1x32xf32>
    %25 = math.exp %24 : vector<1x32xf32>
    %cst_22 = arith.constant 1.000000e+00 : f32
    %26 = vector.broadcast %cst_22 : f32 to vector<1x32xf32>
    %27 = arith.addf %26, %25 : vector<1x32xf32>
    %28 = arith.divf %26, %27 : vector<1x32xf32>
    %29 = vector.extract_strided_slice %22 {offsets = [0, 32], sizes = [1, 32], strides = [1, 1]} : vector<1x128xf32> to vector<1x32xf32>
    %30 = arith.negf %29 : vector<1x32xf32>
    %31 = math.exp %30 : vector<1x32xf32>
    %cst_23 = arith.constant 1.000000e+00 : f32
    %32 = vector.broadcast %cst_23 : f32 to vector<1x32xf32>
    %33 = arith.addf %32, %31 : vector<1x32xf32>
    %34 = arith.divf %32, %33 : vector<1x32xf32>
    %35 = vector.extract_strided_slice %22 {offsets = [0, 64], sizes = [1, 32], strides = [1, 1]} : vector<1x128xf32> to vector<1x32xf32>
    %36 = math.tanh %35 : vector<1x32xf32>
    %37 = vector.extract_strided_slice %22 {offsets = [0, 96], sizes = [1, 32], strides = [1, 1]} : vector<1x128xf32> to vector<1x32xf32>
    %38 = arith.negf %37 : vector<1x32xf32>
    %39 = math.exp %38 : vector<1x32xf32>
    %cst_24 = arith.constant 1.000000e+00 : f32
    %40 = vector.broadcast %cst_24 : f32 to vector<1x32xf32>
    %41 = arith.addf %40, %39 : vector<1x32xf32>
    %42 = arith.divf %40, %41 : vector<1x32xf32>
    %c0_25 = arith.constant 0 : index
    %c0_26 = arith.constant 0 : index
    %43 = vector.load %arg8[%c0_25, %c0_26] : memref<1x32xf32, #tpu.memory_space<vmem>>, vector<1x32xf32>
    %44 = arith.mulf %34, %43 : vector<1x32xf32>
    %45 = arith.mulf %28, %36 : vector<1x32xf32>
    %46 = arith.addf %44, %45 : vector<1x32xf32>
    %47 = math.tanh %46 : vector<1x32xf32>
    %48 = arith.mulf %42, %47 : vector<1x32xf32>
    %c0_27 = arith.constant 0 : index
    %c0_28 = arith.constant 0 : index
    %49 = vector.load %arg8[%c0_27, %c0_28] : memref<1x32xf32, #tpu.memory_space<vmem>>, vector<1x32xf32>
    tpu.vector_store %arg8[%c0_27, %c0_28], %46 {strides = array<i32>} : memref<1x32xf32, #tpu.memory_space<vmem>>, vector<1x32xf32>,
    %c0_29 = arith.constant 0 : index
    %c0_30 = arith.constant 0 : index
    %50 = vector.load %arg7[%c0_29, %c0_30] : memref<1x32xf32, #tpu.memory_space<vmem>>, vector<1x32xf32>
    tpu.vector_store %arg7[%c0_29, %c0_30], %48 {strides = array<i32>} : memref<1x32xf32, #tpu.memory_space<vmem>>, vector<1x32xf32>,
    %c0_31 = arith.constant 0 : index
    %51 = arith.index_cast %15 : i32 to index
    %c0_32 = arith.constant 0 : index
    %52 = vector.load %arg5[%c0_31, %51, %c0_32] : memref<1x8x32xf32, #tpu.memory_space<vmem>>, vector<1x1x32xf32>
    %53 = vector.shape_cast %52 : vector<1x1x32xf32> to vector<1x32xf32>
    %54 = vector.shape_cast %48 : vector<1x32xf32> to vector<1x1x32xf32>
    tpu.vector_store %arg5[%c0_31, %51, %c0_32], %54 {strides = array<i32>} : memref<1x8x32xf32, #tpu.memory_space<vmem>>, vector<1x1x32xf32>,
    %c1_i32_33 = arith.constant 1 : i32
    %c7_i32_34 = arith.constant 7 : i32
    %55 = arith.subi %c7_i32_34, %c1_i32_33 : i32
    %56 = arith.select %13, %55, %c1_i32_33 : i32
    %57 = arith.index_cast %56 : i32 to index
    %c0_35 = arith.constant 0 : index
    %58 = vector.load %arg6[%57, %c0_35] : memref<8x128xf32, #tpu.memory_space<vmem>>, vector<1x128xf32>
    %c0_36 = arith.constant 0 : index
    %c0_37 = arith.constant 0 : index
    %59 = vector.load %arg7[%c0_36, %c0_37] : memref<1x32xf32, #tpu.memory_space<vmem>>, vector<1x32xf32>
    %c0_38 = arith.constant 0 : index
    %c0_39 = arith.constant 0 : index
    %c0_40 = arith.constant 0 : index
    %60 = vector.load %arg3[%c0_38, %c0_39, %c0_40] : memref<1x32x128xf32, #tpu.memory_space<vmem>>, vector<1x32x128xf32>
    %61 = vector.shape_cast %60 : vector<1x32x128xf32> to vector<32x128xf32>
    %cst_41 = arith.constant dense<0.000000e+00> : vector<1x128xf32>
    %62 = tpu.matmul %59, %61, %cst_41 {dimension_numbers = #tpu.dot_dimension_numbers<[1], [0], [0], [1], [0, 0, 1, 1], [], []>} : vector<1x32xf32>, vector<32x128xf32>, vector<1x128xf32> -> vector<1x128xf32>
    %63 = arith.addf %58, %62 : vector<1x128xf32>
    %64 = vector.extract_strided_slice %63 {offsets = [0, 0], sizes = [1, 32], strides = [1, 1]} : vector<1x128xf32> to vector<1x32xf32>
    %65 = arith.negf %64 : vector<1x32xf32>
    %66 = math.exp %65 : vector<1x32xf32>
    %cst_42 = arith.constant 1.000000e+00 : f32
    %67 = vector.broadcast %cst_42 : f32 to vector<1x32xf32>
    %68 = arith.addf %67, %66 : vector<1x32xf32>
    %69 = arith.divf %67, %68 : vector<1x32xf32>
    %70 = vector.extract_strided_slice %63 {offsets = [0, 32], sizes = [1, 32], strides = [1, 1]} : vector<1x128xf32> to vector<1x32xf32>
    %71 = arith.negf %70 : vector<1x32xf32>
    %72 = math.exp %71 : vector<1x32xf32>
    %cst_43 = arith.constant 1.000000e+00 : f32
    %73 = vector.broadcast %cst_43 : f32 to vector<1x32xf32>
    %74 = arith.addf %73, %72 : vector<1x32xf32>
    %75 = arith.divf %73, %74 : vector<1x32xf32>
    %76 = vector.extract_strided_slice %63 {offsets = [0, 64], sizes = [1, 32], strides = [1, 1]} : vector<1x128xf32> to vector<1x32xf32>
    %77 = math.tanh %76 : vector<1x32xf32>
    %78 = vector.extract_strided_slice %63 {offsets = [0, 96], sizes = [1, 32], strides = [1, 1]} : vector<1x128xf32> to vector<1x32xf32>
    %79 = arith.negf %78 : vector<1x32xf32>
    %80 = math.exp %79 : vector<1x32xf32>
    %cst_44 = arith.constant 1.000000e+00 : f32
    %81 = vector.broadcast %cst_44 : f32 to vector<1x32xf32>
    %82 = arith.addf %81, %80 : vector<1x32xf32>
    %83 = arith.divf %81, %82 : vector<1x32xf32>
    %c0_45 = arith.constant 0 : index
    %c0_46 = arith.constant 0 : index
    %84 = vector.load %arg8[%c0_45, %c0_46] : memref<1x32xf32, #tpu.memory_space<vmem>>, vector<1x32xf32>
    %85 = arith.mulf %75, %84 : vector<1x32xf32>
    %86 = arith.mulf %69, %77 : vector<1x32xf32>
    %87 = arith.addf %85, %86 : vector<1x32xf32>
    %88 = math.tanh %87 : vector<1x32xf32>
    %89 = arith.mulf %83, %88 : vector<1x32xf32>
    %c0_47 = arith.constant 0 : index
    %c0_48 = arith.constant 0 : index
    %90 = vector.load %arg8[%c0_47, %c0_48] : memref<1x32xf32, #tpu.memory_space<vmem>>, vector<1x32xf32>
    tpu.vector_store %arg8[%c0_47, %c0_48], %87 {strides = array<i32>} : memref<1x32xf32, #tpu.memory_space<vmem>>, vector<1x32xf32>,
    %c0_49 = arith.constant 0 : index
    %c0_50 = arith.constant 0 : index
    %91 = vector.load %arg7[%c0_49, %c0_50] : memref<1x32xf32, #tpu.memory_space<vmem>>, vector<1x32xf32>
    tpu.vector_store %arg7[%c0_49, %c0_50], %89 {strides = array<i32>} : memref<1x32xf32, #tpu.memory_space<vmem>>, vector<1x32xf32>,
    %c0_51 = arith.constant 0 : index
    %92 = arith.index_cast %56 : i32 to index
    %c0_52 = arith.constant 0 : index
    %93 = vector.load %arg5[%c0_51, %92, %c0_52] : memref<1x8x32xf32, #tpu.memory_space<vmem>>, vector<1x1x32xf32>
    %94 = vector.shape_cast %93 : vector<1x1x32xf32> to vector<1x32xf32>
    %95 = vector.shape_cast %89 : vector<1x32xf32> to vector<1x1x32xf32>
    tpu.vector_store %arg5[%c0_51, %92, %c0_52], %95 {strides = array<i32>} : memref<1x8x32xf32, #tpu.memory_space<vmem>>, vector<1x1x32xf32>,
    %c2_i32 = arith.constant 2 : i32
    %c7_i32_53 = arith.constant 7 : i32
    %96 = arith.subi %c7_i32_53, %c2_i32 : i32
    %97 = arith.select %13, %96, %c2_i32 : i32
    %98 = arith.index_cast %97 : i32 to index
    %c0_54 = arith.constant 0 : index
    %99 = vector.load %arg6[%98, %c0_54] : memref<8x128xf32, #tpu.memory_space<vmem>>, vector<1x128xf32>
    %c0_55 = arith.constant 0 : index
    %c0_56 = arith.constant 0 : index
    %100 = vector.load %arg7[%c0_55, %c0_56] : memref<1x32xf32, #tpu.memory_space<vmem>>, vector<1x32xf32>
    %c0_57 = arith.constant 0 : index
    %c0_58 = arith.constant 0 : index
    %c0_59 = arith.constant 0 : index
    %101 = vector.load %arg3[%c0_57, %c0_58, %c0_59] : memref<1x32x128xf32, #tpu.memory_space<vmem>>, vector<1x32x128xf32>
    %102 = vector.shape_cast %101 : vector<1x32x128xf32> to vector<32x128xf32>
    %cst_60 = arith.constant dense<0.000000e+00> : vector<1x128xf32>
    %103 = tpu.matmul %100, %102, %cst_60 {dimension_numbers = #tpu.dot_dimension_numbers<[1], [0], [0], [1], [0, 0, 1, 1], [], []>} : vector<1x32xf32>, vector<32x128xf32>, vector<1x128xf32> -> vector<1x128xf32>
    %104 = arith.addf %99, %103 : vector<1x128xf32>
    %105 = vector.extract_strided_slice %104 {offsets = [0, 0], sizes = [1, 32], strides = [1, 1]} : vector<1x128xf32> to vector<1x32xf32>
    %106 = arith.negf %105 : vector<1x32xf32>
    %107 = math.exp %106 : vector<1x32xf32>
    %cst_61 = arith.constant 1.000000e+00 : f32
    %108 = vector.broadcast %cst_61 : f32 to vector<1x32xf32>
    %109 = arith.addf %108, %107 : vector<1x32xf32>
    %110 = arith.divf %108, %109 : vector<1x32xf32>
    %111 = vector.extract_strided_slice %104 {offsets = [0, 32], sizes = [1, 32], strides = [1, 1]} : vector<1x128xf32> to vector<1x32xf32>
    %112 = arith.negf %111 : vector<1x32xf32>
    %113 = math.exp %112 : vector<1x32xf32>
    %cst_62 = arith.constant 1.000000e+00 : f32
    %114 = vector.broadcast %cst_62 : f32 to vector<1x32xf32>
    %115 = arith.addf %114, %113 : vector<1x32xf32>
    %116 = arith.divf %114, %115 : vector<1x32xf32>
    %117 = vector.extract_strided_slice %104 {offsets = [0, 64], sizes = [1, 32], strides = [1, 1]} : vector<1x128xf32> to vector<1x32xf32>
    %118 = math.tanh %117 : vector<1x32xf32>
    %119 = vector.extract_strided_slice %104 {offsets = [0, 96], sizes = [1, 32], strides = [1, 1]} : vector<1x128xf32> to vector<1x32xf32>
    %120 = arith.negf %119 : vector<1x32xf32>
    %121 = math.exp %120 : vector<1x32xf32>
    %cst_63 = arith.constant 1.000000e+00 : f32
    %122 = vector.broadcast %cst_63 : f32 to vector<1x32xf32>
    %123 = arith.addf %122, %121 : vector<1x32xf32>
    %124 = arith.divf %122, %123 : vector<1x32xf32>
    %c0_64 = arith.constant 0 : index
    %c0_65 = arith.constant 0 : index
    %125 = vector.load %arg8[%c0_64, %c0_65] : memref<1x32xf32, #tpu.memory_space<vmem>>, vector<1x32xf32>
    %126 = arith.mulf %116, %125 : vector<1x32xf32>
    %127 = arith.mulf %110, %118 : vector<1x32xf32>
    %128 = arith.addf %126, %127 : vector<1x32xf32>
    %129 = math.tanh %128 : vector<1x32xf32>
    %130 = arith.mulf %124, %129 : vector<1x32xf32>
    %c0_66 = arith.constant 0 : index
    %c0_67 = arith.constant 0 : index
    %131 = vector.load %arg8[%c0_66, %c0_67] : memref<1x32xf32, #tpu.memory_space<vmem>>, vector<1x32xf32>
    tpu.vector_store %arg8[%c0_66, %c0_67], %128 {strides = array<i32>} : memref<1x32xf32, #tpu.memory_space<vmem>>, vector<1x32xf32>,
    %c0_68 = arith.constant 0 : index
    %c0_69 = arith.constant 0 : index
    %132 = vector.load %arg7[%c0_68, %c0_69] : memref<1x32xf32, #tpu.memory_space<vmem>>, vector<1x32xf32>
    tpu.vector_store %arg7[%c0_68, %c0_69], %130 {strides = array<i32>} : memref<1x32xf32, #tpu.memory_space<vmem>>, vector<1x32xf32>,
    %c0_70 = arith.constant 0 : index
    %133 = arith.index_cast %97 : i32 to index
    %c0_71 = arith.constant 0 : index
    %134 = vector.load %arg5[%c0_70, %133, %c0_71] : memref<1x8x32xf32, #tpu.memory_space<vmem>>, vector<1x1x32xf32>
    %135 = vector.shape_cast %134 : vector<1x1x32xf32> to vector<1x32xf32>
    %136 = vector.shape_cast %130 : vector<1x32xf32> to vector<1x1x32xf32>
    tpu.vector_store %arg5[%c0_70, %133, %c0_71], %136 {strides = array<i32>} : memref<1x8x32xf32, #tpu.memory_space<vmem>>, vector<1x1x32xf32>,
    %c3_i32 = arith.constant 3 : i32
    %c7_i32_72 = arith.constant 7 : i32
    %137 = arith.subi %c7_i32_72, %c3_i32 : i32
    %138 = arith.select %13, %137, %c3_i32 : i32
    %139 = arith.index_cast %138 : i32 to index
    %c0_73 = arith.constant 0 : index
    %140 = vector.load %arg6[%139, %c0_73] : memref<8x128xf32, #tpu.memory_space<vmem>>, vector<1x128xf32>
    %c0_74 = arith.constant 0 : index
    %c0_75 = arith.constant 0 : index
    %141 = vector.load %arg7[%c0_74, %c0_75] : memref<1x32xf32, #tpu.memory_space<vmem>>, vector<1x32xf32>
    %c0_76 = arith.constant 0 : index
    %c0_77 = arith.constant 0 : index
    %c0_78 = arith.constant 0 : index
    %142 = vector.load %arg3[%c0_76, %c0_77, %c0_78] : memref<1x32x128xf32, #tpu.memory_space<vmem>>, vector<1x32x128xf32>
    %143 = vector.shape_cast %142 : vector<1x32x128xf32> to vector<32x128xf32>
    %cst_79 = arith.constant dense<0.000000e+00> : vector<1x128xf32>
    %144 = tpu.matmul %141, %143, %cst_79 {dimension_numbers = #tpu.dot_dimension_numbers<[1], [0], [0], [1], [0, 0, 1, 1], [], []>} : vector<1x32xf32>, vector<32x128xf32>, vector<1x128xf32> -> vector<1x128xf32>
    %145 = arith.addf %140, %144 : vector<1x128xf32>
    %146 = vector.extract_strided_slice %145 {offsets = [0, 0], sizes = [1, 32], strides = [1, 1]} : vector<1x128xf32> to vector<1x32xf32>
    %147 = arith.negf %146 : vector<1x32xf32>
    %148 = math.exp %147 : vector<1x32xf32>
    %cst_80 = arith.constant 1.000000e+00 : f32
    %149 = vector.broadcast %cst_80 : f32 to vector<1x32xf32>
    %150 = arith.addf %149, %148 : vector<1x32xf32>
    %151 = arith.divf %149, %150 : vector<1x32xf32>
    %152 = vector.extract_strided_slice %145 {offsets = [0, 32], sizes = [1, 32], strides = [1, 1]} : vector<1x128xf32> to vector<1x32xf32>
    %153 = arith.negf %152 : vector<1x32xf32>
    %154 = math.exp %153 : vector<1x32xf32>
    %cst_81 = arith.constant 1.000000e+00 : f32
    %155 = vector.broadcast %cst_81 : f32 to vector<1x32xf32>
    %156 = arith.addf %155, %154 : vector<1x32xf32>
    %157 = arith.divf %155, %156 : vector<1x32xf32>
    %158 = vector.extract_strided_slice %145 {offsets = [0, 64], sizes = [1, 32], strides = [1, 1]} : vector<1x128xf32> to vector<1x32xf32>
    %159 = math.tanh %158 : vector<1x32xf32>
    %160 = vector.extract_strided_slice %145 {offsets = [0, 96], sizes = [1, 32], strides = [1, 1]} : vector<1x128xf32> to vector<1x32xf32>
    %161 = arith.negf %160 : vector<1x32xf32>
    %162 = math.exp %161 : vector<1x32xf32>
    %cst_82 = arith.constant 1.000000e+00 : f32
    %163 = vector.broadcast %cst_82 : f32 to vector<1x32xf32>
    %164 = arith.addf %163, %162 : vector<1x32xf32>
    %165 = arith.divf %163, %164 : vector<1x32xf32>
    %c0_83 = arith.constant 0 : index
    %c0_84 = arith.constant 0 : index
    %166 = vector.load %arg8[%c0_83, %c0_84] : memref<1x32xf32, #tpu.memory_space<vmem>>, vector<1x32xf32>
    %167 = arith.mulf %157, %166 : vector<1x32xf32>
    %168 = arith.mulf %151, %159 : vector<1x32xf32>
    %169 = arith.addf %167, %168 : vector<1x32xf32>
    %170 = math.tanh %169 : vector<1x32xf32>
    %171 = arith.mulf %165, %170 : vector<1x32xf32>
    %c0_85 = arith.constant 0 : index
    %c0_86 = arith.constant 0 : index
    %172 = vector.load %arg8[%c0_85, %c0_86] : memref<1x32xf32, #tpu.memory_space<vmem>>, vector<1x32xf32>
    tpu.vector_store %arg8[%c0_85, %c0_86], %169 {strides = array<i32>} : memref<1x32xf32, #tpu.memory_space<vmem>>, vector<1x32xf32>,
    %c0_87 = arith.constant 0 : index
    %c0_88 = arith.constant 0 : index
    %173 = vector.load %arg7[%c0_87, %c0_88] : memref<1x32xf32, #tpu.memory_space<vmem>>, vector<1x32xf32>
    tpu.vector_store %arg7[%c0_87, %c0_88], %171 {strides = array<i32>} : memref<1x32xf32, #tpu.memory_space<vmem>>, vector<1x32xf32>,
    %c0_89 = arith.constant 0 : index
    %174 = arith.index_cast %138 : i32 to index
    %c0_90 = arith.constant 0 : index
    %175 = vector.load %arg5[%c0_89, %174, %c0_90] : memref<1x8x32xf32, #tpu.memory_space<vmem>>, vector<1x1x32xf32>
    %176 = vector.shape_cast %175 : vector<1x1x32xf32> to vector<1x32xf32>
    %177 = vector.shape_cast %171 : vector<1x32xf32> to vector<1x1x32xf32>
    tpu.vector_store %arg5[%c0_89, %174, %c0_90], %177 {strides = array<i32>} : memref<1x8x32xf32, #tpu.memory_space<vmem>>, vector<1x1x32xf32>,
    %c4_i32 = arith.constant 4 : i32
    %c7_i32_91 = arith.constant 7 : i32
    %178 = arith.subi %c7_i32_91, %c4_i32 : i32
    %179 = arith.select %13, %178, %c4_i32 : i32
    %180 = arith.index_cast %179 : i32 to index
    %c0_92 = arith.constant 0 : index
    %181 = vector.load %arg6[%180, %c0_92] : memref<8x128xf32, #tpu.memory_space<vmem>>, vector<1x128xf32>
    %c0_93 = arith.constant 0 : index
    %c0_94 = arith.constant 0 : index
    %182 = vector.load %arg7[%c0_93, %c0_94] : memref<1x32xf32, #tpu.memory_space<vmem>>, vector<1x32xf32>
    %c0_95 = arith.constant 0 : index
    %c0_96 = arith.constant 0 : index
    %c0_97 = arith.constant 0 : index
    %183 = vector.load %arg3[%c0_95, %c0_96, %c0_97] : memref<1x32x128xf32, #tpu.memory_space<vmem>>, vector<1x32x128xf32>
    %184 = vector.shape_cast %183 : vector<1x32x128xf32> to vector<32x128xf32>
    %cst_98 = arith.constant dense<0.000000e+00> : vector<1x128xf32>
    %185 = tpu.matmul %182, %184, %cst_98 {dimension_numbers = #tpu.dot_dimension_numbers<[1], [0], [0], [1], [0, 0, 1, 1], [], []>} : vector<1x32xf32>, vector<32x128xf32>, vector<1x128xf32> -> vector<1x128xf32>
    %186 = arith.addf %181, %185 : vector<1x128xf32>
    %187 = vector.extract_strided_slice %186 {offsets = [0, 0], sizes = [1, 32], strides = [1, 1]} : vector<1x128xf32> to vector<1x32xf32>
    %188 = arith.negf %187 : vector<1x32xf32>
    %189 = math.exp %188 : vector<1x32xf32>
    %cst_99 = arith.constant 1.000000e+00 : f32
    %190 = vector.broadcast %cst_99 : f32 to vector<1x32xf32>
    %191 = arith.addf %190, %189 : vector<1x32xf32>
    %192 = arith.divf %190, %191 : vector<1x32xf32>
    %193 = vector.extract_strided_slice %186 {offsets = [0, 32], sizes = [1, 32], strides = [1, 1]} : vector<1x128xf32> to vector<1x32xf32>
    %194 = arith.negf %193 : vector<1x32xf32>
    %195 = math.exp %194 : vector<1x32xf32>
    %cst_100 = arith.constant 1.000000e+00 : f32
    %196 = vector.broadcast %cst_100 : f32 to vector<1x32xf32>
    %197 = arith.addf %196, %195 : vector<1x32xf32>
    %198 = arith.divf %196, %197 : vector<1x32xf32>
    %199 = vector.extract_strided_slice %186 {offsets = [0, 64], sizes = [1, 32], strides = [1, 1]} : vector<1x128xf32> to vector<1x32xf32>
    %200 = math.tanh %199 : vector<1x32xf32>
    %201 = vector.extract_strided_slice %186 {offsets = [0, 96], sizes = [1, 32], strides = [1, 1]} : vector<1x128xf32> to vector<1x32xf32>
    %202 = arith.negf %201 : vector<1x32xf32>
    %203 = math.exp %202 : vector<1x32xf32>
    %cst_101 = arith.constant 1.000000e+00 : f32
    %204 = vector.broadcast %cst_101 : f32 to vector<1x32xf32>
    %205 = arith.addf %204, %203 : vector<1x32xf32>
    %206 = arith.divf %204, %205 : vector<1x32xf32>
    %c0_102 = arith.constant 0 : index
    %c0_103 = arith.constant 0 : index
    %207 = vector.load %arg8[%c0_102, %c0_103] : memref<1x32xf32, #tpu.memory_space<vmem>>, vector<1x32xf32>
    %208 = arith.mulf %198, %207 : vector<1x32xf32>
    %209 = arith.mulf %192, %200 : vector<1x32xf32>
    %210 = arith.addf %208, %209 : vector<1x32xf32>
    %211 = math.tanh %210 : vector<1x32xf32>
    %212 = arith.mulf %206, %211 : vector<1x32xf32>
    %c0_104 = arith.constant 0 : index
    %c0_105 = arith.constant 0 : index
    %213 = vector.load %arg8[%c0_104, %c0_105] : memref<1x32xf32, #tpu.memory_space<vmem>>, vector<1x32xf32>
    tpu.vector_store %arg8[%c0_104, %c0_105], %210 {strides = array<i32>} : memref<1x32xf32, #tpu.memory_space<vmem>>, vector<1x32xf32>,
    %c0_106 = arith.constant 0 : index
    %c0_107 = arith.constant 0 : index
    %214 = vector.load %arg7[%c0_106, %c0_107] : memref<1x32xf32, #tpu.memory_space<vmem>>, vector<1x32xf32>
    tpu.vector_store %arg7[%c0_106, %c0_107], %212 {strides = array<i32>} : memref<1x32xf32, #tpu.memory_space<vmem>>, vector<1x32xf32>,
    %c0_108 = arith.constant 0 : index
    %215 = arith.index_cast %179 : i32 to index
    %c0_109 = arith.constant 0 : index
    %216 = vector.load %arg5[%c0_108, %215, %c0_109] : memref<1x8x32xf32, #tpu.memory_space<vmem>>, vector<1x1x32xf32>
    %217 = vector.shape_cast %216 : vector<1x1x32xf32> to vector<1x32xf32>
    %218 = vector.shape_cast %212 : vector<1x32xf32> to vector<1x1x32xf32>
    tpu.vector_store %arg5[%c0_108, %215, %c0_109], %218 {strides = array<i32>} : memref<1x8x32xf32, #tpu.memory_space<vmem>>, vector<1x1x32xf32>,
    %c5_i32 = arith.constant 5 : i32
    %c7_i32_110 = arith.constant 7 : i32
    %219 = arith.subi %c7_i32_110, %c5_i32 : i32
    %220 = arith.select %13, %219, %c5_i32 : i32
    %221 = arith.index_cast %220 : i32 to index
    %c0_111 = arith.constant 0 : index
    %222 = vector.load %arg6[%221, %c0_111] : memref<8x128xf32, #tpu.memory_space<vmem>>, vector<1x128xf32>
    %c0_112 = arith.constant 0 : index
    %c0_113 = arith.constant 0 : index
    %223 = vector.load %arg7[%c0_112, %c0_113] : memref<1x32xf32, #tpu.memory_space<vmem>>, vector<1x32xf32>
    %c0_114 = arith.constant 0 : index
    %c0_115 = arith.constant 0 : index
    %c0_116 = arith.constant 0 : index
    %224 = vector.load %arg3[%c0_114, %c0_115, %c0_116] : memref<1x32x128xf32, #tpu.memory_space<vmem>>, vector<1x32x128xf32>
    %225 = vector.shape_cast %224 : vector<1x32x128xf32> to vector<32x128xf32>
    %cst_117 = arith.constant dense<0.000000e+00> : vector<1x128xf32>
    %226 = tpu.matmul %223, %225, %cst_117 {dimension_numbers = #tpu.dot_dimension_numbers<[1], [0], [0], [1], [0, 0, 1, 1], [], []>} : vector<1x32xf32>, vector<32x128xf32>, vector<1x128xf32> -> vector<1x128xf32>
    %227 = arith.addf %222, %226 : vector<1x128xf32>
    %228 = vector.extract_strided_slice %227 {offsets = [0, 0], sizes = [1, 32], strides = [1, 1]} : vector<1x128xf32> to vector<1x32xf32>
    %229 = arith.negf %228 : vector<1x32xf32>
    %230 = math.exp %229 : vector<1x32xf32>
    %cst_118 = arith.constant 1.000000e+00 : f32
    %231 = vector.broadcast %cst_118 : f32 to vector<1x32xf32>
    %232 = arith.addf %231, %230 : vector<1x32xf32>
    %233 = arith.divf %231, %232 : vector<1x32xf32>
    %234 = vector.extract_strided_slice %227 {offsets = [0, 32], sizes = [1, 32], strides = [1, 1]} : vector<1x128xf32> to vector<1x32xf32>
    %235 = arith.negf %234 : vector<1x32xf32>
    %236 = math.exp %235 : vector<1x32xf32>
    %cst_119 = arith.constant 1.000000e+00 : f32
    %237 = vector.broadcast %cst_119 : f32 to vector<1x32xf32>
    %238 = arith.addf %237, %236 : vector<1x32xf32>
    %239 = arith.divf %237, %238 : vector<1x32xf32>
    %240 = vector.extract_strided_slice %227 {offsets = [0, 64], sizes = [1, 32], strides = [1, 1]} : vector<1x128xf32> to vector<1x32xf32>
    %241 = math.tanh %240 : vector<1x32xf32>
    %242 = vector.extract_strided_slice %227 {offsets = [0, 96], sizes = [1, 32], strides = [1, 1]} : vector<1x128xf32> to vector<1x32xf32>
    %243 = arith.negf %242 : vector<1x32xf32>
    %244 = math.exp %243 : vector<1x32xf32>
    %cst_120 = arith.constant 1.000000e+00 : f32
    %245 = vector.broadcast %cst_120 : f32 to vector<1x32xf32>
    %246 = arith.addf %245, %244 : vector<1x32xf32>
    %247 = arith.divf %245, %246 : vector<1x32xf32>
    %c0_121 = arith.constant 0 : index
    %c0_122 = arith.constant 0 : index
    %248 = vector.load %arg8[%c0_121, %c0_122] : memref<1x32xf32, #tpu.memory_space<vmem>>, vector<1x32xf32>
    %249 = arith.mulf %239, %248 : vector<1x32xf32>
    %250 = arith.mulf %233, %241 : vector<1x32xf32>
    %251 = arith.addf %249, %250 : vector<1x32xf32>
    %252 = math.tanh %251 : vector<1x32xf32>
    %253 = arith.mulf %247, %252 : vector<1x32xf32>
    %c0_123 = arith.constant 0 : index
    %c0_124 = arith.constant 0 : index
    %254 = vector.load %arg8[%c0_123, %c0_124] : memref<1x32xf32, #tpu.memory_space<vmem>>, vector<1x32xf32>
    tpu.vector_store %arg8[%c0_123, %c0_124], %251 {strides = array<i32>} : memref<1x32xf32, #tpu.memory_space<vmem>>, vector<1x32xf32>,
    %c0_125 = arith.constant 0 : index
    %c0_126 = arith.constant 0 : index
    %255 = vector.load %arg7[%c0_125, %c0_126] : memref<1x32xf32, #tpu.memory_space<vmem>>, vector<1x32xf32>
    tpu.vector_store %arg7[%c0_125, %c0_126], %253 {strides = array<i32>} : memref<1x32xf32, #tpu.memory_space<vmem>>, vector<1x32xf32>,
    %c0_127 = arith.constant 0 : index
    %256 = arith.index_cast %220 : i32 to index
    %c0_128 = arith.constant 0 : index
    %257 = vector.load %arg5[%c0_127, %256, %c0_128] : memref<1x8x32xf32, #tpu.memory_space<vmem>>, vector<1x1x32xf32>
    %258 = vector.shape_cast %257 : vector<1x1x32xf32> to vector<1x32xf32>
    %259 = vector.shape_cast %253 : vector<1x32xf32> to vector<1x1x32xf32>
    tpu.vector_store %arg5[%c0_127, %256, %c0_128], %259 {strides = array<i32>} : memref<1x8x32xf32, #tpu.memory_space<vmem>>, vector<1x1x32xf32>,
    %c6_i32 = arith.constant 6 : i32
    %c7_i32_129 = arith.constant 7 : i32
    %260 = arith.subi %c7_i32_129, %c6_i32 : i32
    %261 = arith.select %13, %260, %c6_i32 : i32
    %262 = arith.index_cast %261 : i32 to index
    %c0_130 = arith.constant 0 : index
    %263 = vector.load %arg6[%262, %c0_130] : memref<8x128xf32, #tpu.memory_space<vmem>>, vector<1x128xf32>
    %c0_131 = arith.constant 0 : index
    %c0_132 = arith.constant 0 : index
    %264 = vector.load %arg7[%c0_131, %c0_132] : memref<1x32xf32, #tpu.memory_space<vmem>>, vector<1x32xf32>
    %c0_133 = arith.constant 0 : index
    %c0_134 = arith.constant 0 : index
    %c0_135 = arith.constant 0 : index
    %265 = vector.load %arg3[%c0_133, %c0_134, %c0_135] : memref<1x32x128xf32, #tpu.memory_space<vmem>>, vector<1x32x128xf32>
    %266 = vector.shape_cast %265 : vector<1x32x128xf32> to vector<32x128xf32>
    %cst_136 = arith.constant dense<0.000000e+00> : vector<1x128xf32>
    %267 = tpu.matmul %264, %266, %cst_136 {dimension_numbers = #tpu.dot_dimension_numbers<[1], [0], [0], [1], [0, 0, 1, 1], [], []>} : vector<1x32xf32>, vector<32x128xf32>, vector<1x128xf32> -> vector<1x128xf32>
    %268 = arith.addf %263, %267 : vector<1x128xf32>
    %269 = vector.extract_strided_slice %268 {offsets = [0, 0], sizes = [1, 32], strides = [1, 1]} : vector<1x128xf32> to vector<1x32xf32>
    %270 = arith.negf %269 : vector<1x32xf32>
    %271 = math.exp %270 : vector<1x32xf32>
    %cst_137 = arith.constant 1.000000e+00 : f32
    %272 = vector.broadcast %cst_137 : f32 to vector<1x32xf32>
    %273 = arith.addf %272, %271 : vector<1x32xf32>
    %274 = arith.divf %272, %273 : vector<1x32xf32>
    %275 = vector.extract_strided_slice %268 {offsets = [0, 32], sizes = [1, 32], strides = [1, 1]} : vector<1x128xf32> to vector<1x32xf32>
    %276 = arith.negf %275 : vector<1x32xf32>
    %277 = math.exp %276 : vector<1x32xf32>
    %cst_138 = arith.constant 1.000000e+00 : f32
    %278 = vector.broadcast %cst_138 : f32 to vector<1x32xf32>
    %279 = arith.addf %278, %277 : vector<1x32xf32>
    %280 = arith.divf %278, %279 : vector<1x32xf32>
    %281 = vector.extract_strided_slice %268 {offsets = [0, 64], sizes = [1, 32], strides = [1, 1]} : vector<1x128xf32> to vector<1x32xf32>
    %282 = math.tanh %281 : vector<1x32xf32>
    %283 = vector.extract_strided_slice %268 {offsets = [0, 96], sizes = [1, 32], strides = [1, 1]} : vector<1x128xf32> to vector<1x32xf32>
    %284 = arith.negf %283 : vector<1x32xf32>
    %285 = math.exp %284 : vector<1x32xf32>
    %cst_139 = arith.constant 1.000000e+00 : f32
    %286 = vector.broadcast %cst_139 : f32 to vector<1x32xf32>
    %287 = arith.addf %286, %285 : vector<1x32xf32>
    %288 = arith.divf %286, %287 : vector<1x32xf32>
    %c0_140 = arith.constant 0 : index
    %c0_141 = arith.constant 0 : index
    %289 = vector.load %arg8[%c0_140, %c0_141] : memref<1x32xf32, #tpu.memory_space<vmem>>, vector<1x32xf32>
    %290 = arith.mulf %280, %289 : vector<1x32xf32>
    %291 = arith.mulf %274, %282 : vector<1x32xf32>
    %292 = arith.addf %290, %291 : vector<1x32xf32>
    %293 = math.tanh %292 : vector<1x32xf32>
    %294 = arith.mulf %288, %293 : vector<1x32xf32>
    %c0_142 = arith.constant 0 : index
    %c0_143 = arith.constant 0 : index
    %295 = vector.load %arg8[%c0_142, %c0_143] : memref<1x32xf32, #tpu.memory_space<vmem>>, vector<1x32xf32>
    tpu.vector_store %arg8[%c0_142, %c0_143], %292 {strides = array<i32>} : memref<1x32xf32, #tpu.memory_space<vmem>>, vector<1x32xf32>,
    %c0_144 = arith.constant 0 : index
    %c0_145 = arith.constant 0 : index
    %296 = vector.load %arg7[%c0_144, %c0_145] : memref<1x32xf32, #tpu.memory_space<vmem>>, vector<1x32xf32>
    tpu.vector_store %arg7[%c0_144, %c0_145], %294 {strides = array<i32>} : memref<1x32xf32, #tpu.memory_space<vmem>>, vector<1x32xf32>,
    %c0_146 = arith.constant 0 : index
    %297 = arith.index_cast %261 : i32 to index
    %c0_147 = arith.constant 0 : index
    %298 = vector.load %arg5[%c0_146, %297, %c0_147] : memref<1x8x32xf32, #tpu.memory_space<vmem>>, vector<1x1x32xf32>
    %299 = vector.shape_cast %298 : vector<1x1x32xf32> to vector<1x32xf32>
    %300 = vector.shape_cast %294 : vector<1x32xf32> to vector<1x1x32xf32>
    tpu.vector_store %arg5[%c0_146, %297, %c0_147], %300 {strides = array<i32>} : memref<1x8x32xf32, #tpu.memory_space<vmem>>, vector<1x1x32xf32>,
    %c7_i32_148 = arith.constant 7 : i32
    %c7_i32_149 = arith.constant 7 : i32
    %301 = arith.subi %c7_i32_149, %c7_i32_148 : i32
    %302 = arith.select %13, %301, %c7_i32_148 : i32
    %303 = arith.index_cast %302 : i32 to index
    %c0_150 = arith.constant 0 : index
    %304 = vector.load %arg6[%303, %c0_150] : memref<8x128xf32, #tpu.memory_space<vmem>>, vector<1x128xf32>
    %c0_151 = arith.constant 0 : index
    %c0_152 = arith.constant 0 : index
    %305 = vector.load %arg7[%c0_151, %c0_152] : memref<1x32xf32, #tpu.memory_space<vmem>>, vector<1x32xf32>
    %c0_153 = arith.constant 0 : index
    %c0_154 = arith.constant 0 : index
    %c0_155 = arith.constant 0 : index
    %306 = vector.load %arg3[%c0_153, %c0_154, %c0_155] : memref<1x32x128xf32, #tpu.memory_space<vmem>>, vector<1x32x128xf32>
    %307 = vector.shape_cast %306 : vector<1x32x128xf32> to vector<32x128xf32>
    %cst_156 = arith.constant dense<0.000000e+00> : vector<1x128xf32>
    %308 = tpu.matmul %305, %307, %cst_156 {dimension_numbers = #tpu.dot_dimension_numbers<[1], [0], [0], [1], [0, 0, 1, 1], [], []>} : vector<1x32xf32>, vector<32x128xf32>, vector<1x128xf32> -> vector<1x128xf32>
    %309 = arith.addf %304, %308 : vector<1x128xf32>
    %310 = vector.extract_strided_slice %309 {offsets = [0, 0], sizes = [1, 32], strides = [1, 1]} : vector<1x128xf32> to vector<1x32xf32>
    %311 = arith.negf %310 : vector<1x32xf32>
    %312 = math.exp %311 : vector<1x32xf32>
    %cst_157 = arith.constant 1.000000e+00 : f32
    %313 = vector.broadcast %cst_157 : f32 to vector<1x32xf32>
    %314 = arith.addf %313, %312 : vector<1x32xf32>
    %315 = arith.divf %313, %314 : vector<1x32xf32>
    %316 = vector.extract_strided_slice %309 {offsets = [0, 32], sizes = [1, 32], strides = [1, 1]} : vector<1x128xf32> to vector<1x32xf32>
    %317 = arith.negf %316 : vector<1x32xf32>
    %318 = math.exp %317 : vector<1x32xf32>
    %cst_158 = arith.constant 1.000000e+00 : f32
    %319 = vector.broadcast %cst_158 : f32 to vector<1x32xf32>
    %320 = arith.addf %319, %318 : vector<1x32xf32>
    %321 = arith.divf %319, %320 : vector<1x32xf32>
    %322 = vector.extract_strided_slice %309 {offsets = [0, 64], sizes = [1, 32], strides = [1, 1]} : vector<1x128xf32> to vector<1x32xf32>
    %323 = math.tanh %322 : vector<1x32xf32>
    %324 = vector.extract_strided_slice %309 {offsets = [0, 96], sizes = [1, 32], strides = [1, 1]} : vector<1x128xf32> to vector<1x32xf32>
    %325 = arith.negf %324 : vector<1x32xf32>
    %326 = math.exp %325 : vector<1x32xf32>
    %cst_159 = arith.constant 1.000000e+00 : f32
    %327 = vector.broadcast %cst_159 : f32 to vector<1x32xf32>
    %328 = arith.addf %327, %326 : vector<1x32xf32>
    %329 = arith.divf %327, %328 : vector<1x32xf32>
    %c0_160 = arith.constant 0 : index
    %c0_161 = arith.constant 0 : index
    %330 = vector.load %arg8[%c0_160, %c0_161] : memref<1x32xf32, #tpu.memory_space<vmem>>, vector<1x32xf32>
    %331 = arith.mulf %321, %330 : vector<1x32xf32>
    %332 = arith.mulf %315, %323 : vector<1x32xf32>
    %333 = arith.addf %331, %332 : vector<1x32xf32>
    %334 = math.tanh %333 : vector<1x32xf32>
    %335 = arith.mulf %329, %334 : vector<1x32xf32>
    %c0_162 = arith.constant 0 : index
    %c0_163 = arith.constant 0 : index
    %336 = vector.load %arg8[%c0_162, %c0_163] : memref<1x32xf32, #tpu.memory_space<vmem>>, vector<1x32xf32>
    tpu.vector_store %arg8[%c0_162, %c0_163], %333 {strides = array<i32>} : memref<1x32xf32, #tpu.memory_space<vmem>>, vector<1x32xf32>,
    %c0_164 = arith.constant 0 : index
    %c0_165 = arith.constant 0 : index
    %337 = vector.load %arg7[%c0_164, %c0_165] : memref<1x32xf32, #tpu.memory_space<vmem>>, vector<1x32xf32>
    tpu.vector_store %arg7[%c0_164, %c0_165], %335 {strides = array<i32>} : memref<1x32xf32, #tpu.memory_space<vmem>>, vector<1x32xf32>,
    %c0_166 = arith.constant 0 : index
    %338 = arith.index_cast %302 : i32 to index
    %c0_167 = arith.constant 0 : index
    %339 = vector.load %arg5[%c0_166, %338, %c0_167] : memref<1x8x32xf32, #tpu.memory_space<vmem>>, vector<1x1x32xf32>
    %340 = vector.shape_cast %339 : vector<1x1x32xf32> to vector<1x32xf32>
    %341 = vector.shape_cast %335 : vector<1x32xf32> to vector<1x1x32xf32>
    tpu.vector_store %arg5[%c0_166, %338, %c0_167], %341 {strides = array<i32>} : memref<1x8x32xf32, #tpu.memory_space<vmem>>, vector<1x1x32xf32>,
    %c8_i32 = arith.constant 8 : i32
    return
  }
  func.func @transform_0(%arg0: i32) -> (i32, i32) {
    %c0_i32 = arith.constant 0 : i32
    %c0_i32_0 = arith.constant 0 : i32
    %c0_i32_1 = arith.constant 0 : i32
    return %c0_i32, %c0_i32_0 : i32, i32
  }
  func.func @transform_1(%arg0: i32) -> (i32, i32, i32) {
    %c0_i32 = arith.constant 0 : i32
    %c0_i32_0 = arith.constant 0 : i32
    %c0_i32_1 = arith.constant 0 : i32
    return %arg0, %c0_i32, %c0_i32_0 : i32, i32, i32
  }
  func.func @transform_2(%arg0: i32) -> (i32, i32, i32) {
    %c0_i32 = arith.constant 0 : i32
    %c0_i32_0 = arith.constant 0 : i32
    %c0_i32_1 = arith.constant 0 : i32
    return %arg0, %c0_i32, %c0_i32_0 : i32, i32, i32
  }
  func.func @transform_3(%arg0: i32) -> (i32, i32, i32) {
    %c0_i32 = arith.constant 0 : i32
    %c0_i32_0 = arith.constant 0 : i32
    %c0_i32_1 = arith.constant 0 : i32
    return %arg0, %c0_i32, %c0_i32_0 : i32, i32, i32
  }
  func.func @transform_4(%arg0: i32) -> (i32, i32, i32) {
    %c0_i32 = arith.constant 0 : i32
    %c0_i32_0 = arith.constant 0 : i32
    %c0_i32_1 = arith.constant 0 : i32
    return %arg0, %c0_i32, %c0_i32_0 : i32, i32, i32
  }
}

</mosaic_0001>

<bundles_post_ra>
// kernel: tpu_custom_call.1
= control target key start
LH: loop header
LB: loop body
LE: loop exit
PB: predicated region body
PF: predicated region fallthrough
CT: control target
= control target key end

     0   :  { %9 = vsyncpa [#allocation6], 0  ;;  %s2199_s0 = inlined_call_operand.vmem [shape: f32[8,33], index: 0, kind: input, shape index: {}]   ;;  %s2200_s1 = inlined_call_operand.vmem [shape: f32[2,33,128], index: 1, kind: input, shape index: {}]   ;;  %s2201_s2 = inlined_call_operand.vmem [shape: f32[2,32,128], index: 2, kind: input, shape index: {}]   ;;  %s2202_s3 = inlined_call_operand.vmem [shape: f32[2,1,128], index: 3, kind: input, shape index: {}]   ;;  %s2203_s4 = inlined_call_operand.hbm [shape: f32[2,8,32], index: 4, kind: output, shape index: {}]  }
   0x1   :  { %11 = vsyncpa [#allocation6 + $0x1], 0  ;;  %s1842_s15 = smov 0   ;;  %s1844_s16 = smov 0  }
   0x2   :  { %s1846_s17 = smov 0   ;;  %s1848_s18 = smov 0  }
   0x3 LB: > { %s1863_s19 = sadd.s32 4294967295, %s1809_s18   ;;  %s1453_s20 = sadd.s32 4294967294, %s1809_s18   ;;  %s1809_s18 = sphi %s1848_s18, %s2209_s18   ;;  %s1805_s17 = sphi %s1846_s17, %s2208_s17   ;;  %s1801_s16 = sphi %s1844_s16, %s2207_s16   ;;  %s1797_s15 = sphi %s1842_s15, %s2206_s15  }
   0x4   : > { %s1867_s21 = sadd.s32 1, %s1809_s18   ;;  %s123_s22 = sadd.s32 1, %s1805_s17 }
   0x5   : > { %s120_s23 = ssub.s32 %s1809_s18, %s1867_s21  ;;  %p133_p0 = scmp.ne.s32.totalorder %s1805_s17, %s1801_s16 }
   0x6   : > { %p121_p1 = scmp.eq.s32.totalorder %s120_s23, 0  ;;  %p134_p2 = scmp.eq.s32.totalorder %s1863_s19, 1 }
   0x7   : > { %p139_p3 = scmp.ne.s32.totalorder %s1801_s16, %s1797_s15  ;;  %p140_p4 = scmp.eq.s32.totalorder %s1453_s20, 1 }
   0x8   : > { %s1878_s24 = scalar_select %p121_p1, %s1805_s17, %s123_s22  }
   0x9   : > { %p1882_p5 = por %p134_p2, %p133_p0  ;;  %p1886_p6 = por %p140_p4, %p139_p3 }
   0xa   : > { %p1456_p7 = scmp.ge.s32.totalorder %s1809_s18, 1  ;;  %p183_p8 = scmp.lt.s32.totalorder %s1809_s18, 3 }
   0xc   : > { %p184_p9 = pnand %p1456_p7, %p183_p8 }
   0xd   : > { %p217_p10 = scmp.lt.s32.totalorder (!%p184_p9), %s1863_s19, 1  ;;  %s1813_s23 = smov (!%p184_p9), 64  }
   0xe   : > { %187 = sbr.rel (%p184_p9) target bundleno = 5625 (0x15f9), region = 36 }
  0x13   : > { %v1811_v0 = vmov 0.0   ;;  %vm1812_vm0 = vmmov 0   ;;  %vm322_vm1 = vcmask 253952   ;;  %s1897_s27 = scalar_select %p217_p10, %s1863_s19, 1  ;;  %vm247_vm2 = vcmask 1040384   ;;  %v230_v11 = vld [vmem:[%s2199_s0] sm:$0xff] }
  0x14   : > { %1539 = vmatprep.subr.mxu0 %v1811_v0  ;;  %1549 = vmatprep.mubr.msk.f32.mxu0 %vm1812_vm0, %v1811_v0  ;;  %323 = vst.msk [vmem:[#allocation3] sm:$0x1] %vm322_vm1, %v1811_v0  ;;  %324 = vst.msk [vmem:[#allocation4] sm:$0x1] %vm322_vm1, %v1811_v0  ;;  %vm334_vm3 = vcmask 261120   ;;  %vm243_vm4 = vcmask 269312  }
  0x15   : > { %1552 = vmatprep.subr.mxu1 %v1811_v0  ;;  %1560 = vmatprep.mubr.msk.f32.mxu1 %vm1812_vm0, %v1811_v0  ;;  %s1640_s28 = smul.u32 40, %s1897_s27  ;;  %s1492_s29 = sshll.u32 %s1897_s27, 5 }
  0x16   : > { %s226_s6 = scalar_lea.vmem %s2201_s2, %s1492_s29  ;;  %s229_s14 = scalar_lea.vmem %s2202_s3, %s1897_s27 }
  0x17   : > { %s221_s9 = scalar_lea.vmem %s2200_s1, %s1640_s28  ;;  %v1914_v1 = vld [vmem:[%s226_s6 + $0x18] sm:$0xff]  ;;  %v1916_v2 = vld [vmem:[%s226_s6 + $0x10] sm:$0xff]  ;;  %v1920_v5 = vld [vmem:[%s226_s6 + $0x8] sm:$0xff]  ;;  %s1814_s27 = smov 32  }
  0x18   : > { %v235_v3 = vld [vmem:[%s221_s9 + $0x20] sm:$0x1]  ;;  %v234_v4 = vld [vmem:[%s221_s9 + $0x18] sm:$0xff]  ;;  %1553 = vmatpush3.msra.mxu1 %v1914_v1  ;;  %v233_v6 = vld [vmem:[%s221_s9 + $0x10] sm:$0xff]  ;;  %s1965_s20 = scalar_select %p134_p2, 7, 0 }
  0x19   : > { %1540 = vmatpush3.msk.msra.mxu0 %vm247_vm2, %v235_v3  ;;  %1554 = vmatprep.subr.mxu1 %v1811_v0  ;;  %v1925_v7 = vld [vmem:[%s226_s6] sm:$0xff]  ;;  %v232_v8 = vld [vmem:[%s221_s9 + $0x8] sm:$0xff]  ;;  %s1815_s28 = smov 96   ;;  %s214_s29 = sand.u32 1, %s1801_s16  }
  0x1a   : > { %1541 = vmatprep.subr.mxu0 %v1811_v0  ;;  %1555 = vmatpush3.msra.mxu1 %v1916_v2  ;;  %v231_v10 = vld [vmem:[%s221_s9] sm:$0xff]  ;;  %s327_s22 = scalar_lea.vmem [#allocation2], %s1965_s20  ;;  %s1457_s30 = sshll.u32 %s214_s29, 3 }
  0x1b   : > { %1542 = vmatpush3.msra.mxu0 %v234_v4  ;;  %1556 = vmatprep.subr.mxu1 %v1811_v0  ;;  %v329_v9 = vld [vmem:[#allocation3] sm:$0x1]  ;;  %v1461_v13 = vld [vmem:[%s229_s14] ss:$0 sm:$0xff]  ;;  %v1466_v21 = vld [vmem:[#allocation4] ss:$0 sm:$0xff] }
  0x1c   : > { %1543 = vmatprep.subr.mxu0 %v1811_v0  ;;  %1557 = vmatpush3.msra.mxu1 %v1920_v5  ;;  %s1979_s5 = scalar_lea.vmem [#allocation5], %s1457_s30 }
  0x1d   : > { %1544 = vmatpush3.msra.mxu0 %v233_v6  ;;  %1558 = vmatprep.subr.mxu1 %v1811_v0  ;;  %s452_s6 = scalar_lea.vmem %s1979_s5, %s1965_s20 [#allocation5] }
  0x1e   : > { %1545 = vmatprep.subr.mxu0 %v1811_v0  ;;  %1559 = vmatpush3.msra.mxu1 %v1925_v7  ;;  %s1998_s7 = scalar_select %p134_p2, 6, 1 }
  0x1f   : > { %1546 = vmatpush3.msra.mxu0 %v232_v8  ;;  %1561 = vmatmul.mubr.msk.f32.vlgmr.msra.gmra.mxu1 %vm334_vm3, %v329_v9  ;;  %s2025_s10 = scalar_select %p134_p2, 5, 2 }
  0x20   : > { %1547 = vmatprep.subr.mxu0 %v1811_v0  ;;  %1563 = vmatprep.subr.mxu1 %v1811_v0  ;;  %s455_s8 = scalar_lea.vmem [#allocation2], %s1998_s7  ;;  %s579_s9 = scalar_lea.vmem %s1979_s5, %s1998_s7 [#allocation5] }
  0x21   : > { %1548 = vmatpush3.msra.mxu0 %v231_v10  ;;  %1564 = vmatpush3.msra.mxu1 %v1914_v1  ;;  %s582_s11 = scalar_lea.vmem [#allocation2], %s2025_s10  ;;  %s706_s12 = scalar_lea.vmem %s1979_s5, %s2025_s10 [#allocation5] }
  0x22   : > { %1550 = vmatmul.mubr.msk.f32.vlgmr.msra.gmra.mxu0 %vm243_vm4, %v230_v11  ;;  %1565 = vmatprep.subr.mxu1 %v1811_v0  ;;  %s2052_s13 = scalar_select %p134_p2, 4, 3 }
  0x23   : > { %1566 = vmatpush3.msra.mxu1 %v1916_v2  ;;  %1571 = vmatprep.mubr.msk.f32.mxu1 %vm1812_vm0, %v1811_v0  ;;  %s2104_s7 = scalar_select %p134_p2, 2, 5 }
  0x24   : > { %1567 = vmatprep.subr.mxu1 %v1811_v0  ;;  %1574 = vmatprep.subr.mxu0 %v1811_v0  ;;  %s709_s14 = scalar_lea.vmem [#allocation2], %s2052_s13  ;;  %s833_s20 = scalar_lea.vmem %s1979_s5, %s2052_s13 [#allocation5] }
  0x25   : > { %1568 = vmatpush3.msra.mxu1 %v1920_v5  ;;  %1575 = vmatpush3.msra.mxu0 %v1914_v1  ;;  %s2121_s10 = scalar_select %p134_p2, 1, 6 }
  0x26   : > { %1569 = vmatprep.subr.mxu1 %v1811_v0  ;;  %1576 = vmatprep.subr.mxu0 %v1811_v0  ;;  %s2138_s13 = scalar_select %p134_p2, 0, 7 }
  0x27   : > { %1570 = vmatpush3.msra.mxu1 %v1925_v7  ;;  %1577 = vmatpush3.msra.mxu0 %v1916_v2 }
  0x28   : > { %1578 = vmatprep.subr.mxu0 %v1811_v0  ;;  %1582 = vmatprep.mubr.msk.f32.mxu0 %vm1812_vm0, %v1811_v0 }
  0x29   : > { %1579 = vmatpush3.msra.mxu0 %v1920_v5  ;;  %1585 = vmatprep.subr.mxu1 %v1811_v0 }
  0x2a   : > { %1580 = vmatprep.subr.mxu0 %v1811_v0 }
  0x2b   : > { %1581 = vmatpush3.msra.mxu0 %v1925_v7 }
  0x2c   : > { %1596 = vmatprep.subr.mxu0 %v1811_v0 }
  0xdf   : > { %v404_v12 = vpop.f32.mrf.mxu1 }
  0xe1   : > { %v1562_v14 = vpop.f32.mrf.mxu1 }
  0xe2   : > { %v317_v15 = vpop.f32.mrf.mxu0 }
  0xe3   : > { %v318_v16 = vadd.f32 %v1461_v13, %v317_v15 }
  0xe4   : > { %v1551_v17 = vpop.f32.mrf.mxu0 }
  0xe5   : > { %321 = vst [vmem:[#allocation2] sm:$0xff] %v318_v16 }
  0xec   : > { %v328_v18 = vld [vmem:[%s327_s22] sm:$0x1]  ;;  %s2078_s22 = scalar_select %p134_p2, 3, 4 }
  0xed   : > { %v408_v19 = vadd.f32 %v404_v12, %v328_v18  ;;  %v456_v39 = vld [vmem:[%s455_s8] sm:$0x1]  ;;  %s963_s8 = scalar_lea.vmem [#allocation2], %s2104_s7 }
  0xee   : > { %v583_v61 = vld [vmem:[%s582_s11] sm:$0x1]  ;;  %s836_s30 = scalar_lea.vmem [#allocation2], %s2078_s22  ;;  %s1090_s11 = scalar_lea.vmem [#allocation2], %s2121_s10 }
  0xef   : > { %1685 = vtanh.f32 %v408_v19  ;;  %v1465_v22 = vmul.f32 -1.442695, %v408_v19 }
  0xf1   : > { %1687 = vpow2.f32 %v1465_v22 }
  0xfc   : > { %v1686_v20 = vpop.eup %1685 }
  0xfd   : > { %427 = vrot.lane.b32.xlu0 %v1686_v20, %s1813_s23 }
  0xfe   : > { %v1688_v23 = vpop.eup %1687 }
  0xff   : > { %v412_v24 = vadd.f32 1.0, %v1688_v23 }
 0x101   : > { %422 = vrot.lane.b32.xlu0 %v1466_v21, %s1814_s27  ;;  %1689 = vrcp.f32 %v412_v24  ;;  %v710_v24 = vld [vmem:[%s709_s14] sm:$0x1]  ;;  %s1217_s14 = scalar_lea.vmem [#allocation2], %s2138_s13 }
 0x10e   : > { %v1690_v25 = vpop.eup %1689 }
 0x16f   : > { %v428_v26 = vpop.permute.xlu0 %427 }
 0x170   : > { %v430_v27 = vmul.f32 %v1690_v25, %v428_v26 }
 0x172   : > { %432 = vrot.lane.b32.xlu1 %v430_v27, %s1814_s27 }
 0x173   : > { %v423_v28 = vpop.permute.xlu0 %422 }
 0x174   : > { %v425_v29 = vmul.f32 %v1690_v25, %v423_v28 }
 0x1e4   : > { %v433_v30 = vpop.permute.xlu1 %432 }
 0x1e5   : > { %v435_v31 = vadd.f32 %v433_v30, %v425_v29 }
 0x1e7   : > { %1691 = vtanh.f32 %v435_v31 }
 0x1f4   : > { %v1692_v32 = vpop.eup %1691 }
 0x1f5   : > { %438 = vrot.lane.b32.xlu1 %v1692_v32, %s1813_s23 }
 0x1f9   : > { %443 = vrot.lane.b32.xlu1 %v435_v31, %s1815_s28 }
 0x267   : > { %v439_v33 = vpop.permute.xlu1 %438 }
 0x268   : > { %v441_v34 = vmul.f32 %v1690_v25, %v439_v33 }
 0x26a   : > { %448 = vrot.lane.b32.xlu0 %v441_v34, %s1814_s27 }
 0x26b   : > { %v444_v35 = vpop.permute.xlu1 %443 }
 0x26c   : > { %446 = vst.msk [vmem:[#allocation4] sm:$0x1] %vm322_vm1, %v444_v35 }
 0x273   : > { %v1469_v36 = vld [vmem:[#allocation4] ss:$0 sm:$0xff] }
 0x274   : > { %549 = vrot.lane.b32.xlu1 %v1469_v36, %s1814_s27 }
 0x2dc   : > { %v449_v37 = vpop.permute.xlu0 %448 }
 0x2dd   : > { %451 = vst.msk [vmem:[#allocation3] sm:$0x1] %vm322_vm1, %v449_v37  ;;  %453 = vst.msk [vmem:[%s452_s6] sm:$0x1] %vm322_vm1, %v449_v37  ;;  %s960_s6 = scalar_lea.vmem %s1979_s5, %s2078_s22 [#allocation5]  ;;  %s1357_s22 = sshll.u32 %s1979_s5, 4  ;;  %s2156_s22 = int_to_ptr.vmem [resolvable:$true] %s1357_s22 }
 0x2e4   : > { %v457_v38 = vld [vmem:[#allocation3] sm:$0x1] }
 0x2e5   : > { %1572 = vmatmul.mubr.msk.f32.vlgmr.msra.gmra.mxu1 %vm334_vm3, %v457_v38 }
 0x2e6   : > { %1586 = vmatpush3.msra.mxu1 %v1914_v1  ;;  %1593 = vmatprep.mubr.msk.f32.mxu1 %vm1812_vm0, %v1811_v0  ;;  %v550_v50 = vpop.permute.xlu1 %549 }
 0x2e7   : > { %1587 = vmatprep.subr.mxu1 %v1811_v0 }
 0x2e8   : > { %1588 = vmatpush3.msra.mxu1 %v1916_v2 }
 0x2e9   : > { %1589 = vmatprep.subr.mxu1 %v1811_v0 }
 0x2ea   : > { %1590 = vmatpush3.msra.mxu1 %v1920_v5 }
 0x2eb   : > { %1591 = vmatprep.subr.mxu1 %v1811_v0 }
 0x2ec   : > { %1592 = vmatpush3.msra.mxu1 %v1925_v7 }
 0x2ed   : > { %1607 = vmatprep.subr.mxu1 %v1811_v0 }
 0x3a5   : > { %v531_v40 = vpop.f32.mrf.mxu1 }
 0x3a6   : > { %v535_v41 = vadd.f32 %v531_v40, %v456_v39 }
 0x3a7   : > { %v1573_v42 = vpop.f32.mrf.mxu1 }
 0x3a8   : > { %1693 = vtanh.f32 %v535_v41  ;;  %v1468_v44 = vmul.f32 -1.442695, %v535_v41 }
 0x3aa   : > { %1695 = vpow2.f32 %v1468_v44 }
 0x3b5   : > { %v1694_v43 = vpop.eup %1693 }
 0x3b6   : > { %554 = vrot.lane.b32.xlu0 %v1694_v43, %s1813_s23 }
 0x3b7   : > { %v1696_v45 = vpop.eup %1695 }
 0x3b8   : > { %v539_v46 = vadd.f32 1.0, %v1696_v45 }
 0x3ba   : > { %1697 = vrcp.f32 %v539_v46  ;;  %v837_v46 = vld [vmem:[%s836_s30] sm:$0x1]  ;;  %s1341_s30 = scalar_lea.vmem %s1979_s5, %s2138_s13 [#allocation5] }
 0x3c7   : > { %v1698_v47 = vpop.eup %1697 }
 0x3c8   : > { %v552_v51 = vmul.f32 %v1698_v47, %v550_v50 }
 0x428   : > { %v555_v48 = vpop.permute.xlu0 %554 }
 0x429   : > { %v557_v49 = vmul.f32 %v1698_v47, %v555_v48 }
 0x42b   : > { %559 = vrot.lane.b32.xlu0 %v557_v49, %s1814_s27 }
 0x49d   : > { %v560_v52 = vpop.permute.xlu0 %559 }
 0x49e   : > { %v562_v53 = vadd.f32 %v560_v52, %v552_v51 }
 0x4a0   : > { %1699 = vtanh.f32 %v562_v53 }
 0x4ad   : > { %v1700_v54 = vpop.eup %1699 }
 0x4ae   : > { %565 = vrot.lane.b32.xlu1 %v1700_v54, %s1813_s23 }
 0x4b2   : > { %570 = vrot.lane.b32.xlu1 %v562_v53, %s1815_s28 }
 0x520   : > { %v566_v55 = vpop.permute.xlu1 %565 }
 0x521   : > { %v568_v56 = vmul.f32 %v1698_v47, %v566_v55 }
 0x523   : > { %575 = vrot.lane.b32.xlu0 %v568_v56, %s1814_s27 }
 0x524   : > { %v571_v57 = vpop.permute.xlu1 %570 }
 0x525   : > { %573 = vst.msk [vmem:[#allocation4] sm:$0x1] %vm322_vm1, %v571_v57 }
 0x52c   : > { %v1472_v58 = vld [vmem:[#allocation4] ss:$0 sm:$0xff] }
 0x52d   : > { %676 = vrot.lane.b32.xlu1 %v1472_v58, %s1814_s27 }
 0x595   : > { %v576_v59 = vpop.permute.xlu0 %575 }
 0x596   : > { %578 = vst.msk [vmem:[#allocation3] sm:$0x1] %vm322_vm1, %v576_v59  ;;  %580 = vst.msk [vmem:[%s579_s9] sm:$0x1] %vm322_vm1, %v576_v59  ;;  %s1087_s9 = scalar_lea.vmem %s1979_s5, %s2104_s7 [#allocation5] }
 0x59d   : > { %v584_v60 = vld [vmem:[#allocation3] sm:$0x1] }
 0x59e   : > { %1583 = vmatmul.mubr.msk.f32.vlgmr.msra.gmra.mxu0 %vm334_vm3, %v584_v60 }
 0x59f   : > { %1597 = vmatpush3.msra.mxu0 %v1914_v1  ;;  %1604 = vmatprep.mubr.msk.f32.mxu0 %vm1812_vm0, %v1811_v0  ;;  %v677_v13 = vpop.permute.xlu1 %676 }
 0x5a0   : > { %1598 = vmatprep.subr.mxu0 %v1811_v0 }
 0x5a1   : > { %1599 = vmatpush3.msra.mxu0 %v1916_v2 }
 0x5a2   : > { %1600 = vmatprep.subr.mxu0 %v1811_v0 }
 0x5a3   : > { %1601 = vmatpush3.msra.mxu0 %v1920_v5 }
 0x5a4   : > { %1602 = vmatprep.subr.mxu0 %v1811_v0 }
 0x5a5   : > { %1603 = vmatpush3.msra.mxu0 %v1925_v7 }
 0x5a6   : > { %1618 = vmatprep.subr.mxu0 %v1811_v0 }
 0x65e   : > { %v658_v62 = vpop.f32.mrf.mxu0 }
 0x65f   : > { %v662_v63 = vadd.f32 %v658_v62, %v583_v61 }
 0x660   : > { %v1584_v3 = vpop.f32.mrf.mxu0 }
 0x661   : > { %1701 = vtanh.f32 %v662_v63  ;;  %v1471_v6 = vmul.f32 -1.442695, %v662_v63 }
 0x663   : > { %1703 = vpow2.f32 %v1471_v6 }
 0x66e   : > { %v1702_v4 = vpop.eup %1701 }
 0x66f   : > { %681 = vrot.lane.b32.xlu0 %v1702_v4, %s1813_s23 }
 0x670   : > { %v1704_v8 = vpop.eup %1703 }
 0x671   : > { %v666_v9 = vadd.f32 1.0, %v1704_v8 }
 0x673   : > { %1705 = vrcp.f32 %v666_v9 }
 0x680   : > { %v1706_v10 = vpop.eup %1705 }
 0x681   : > { %v679_v14 = vmul.f32 %v1706_v10, %v677_v13 }
 0x6e1   : > { %v682_v11 = vpop.permute.xlu0 %681 }
 0x6e2   : > { %v684_v12 = vmul.f32 %v1706_v10, %v682_v11 }
 0x6e4   : > { %686 = vrot.lane.b32.xlu0 %v684_v12, %s1814_s27 }
 0x756   : > { %v687_v15 = vpop.permute.xlu0 %686 }
 0x757   : > { %v689_v16 = vadd.f32 %v687_v15, %v679_v14 }
 0x759   : > { %1707 = vtanh.f32 %v689_v16 }
 0x766   : > { %v1708_v17 = vpop.eup %1707 }
 0x767   : > { %692 = vrot.lane.b32.xlu1 %v1708_v17, %s1813_s23 }
 0x76b   : > { %697 = vrot.lane.b32.xlu1 %v689_v16, %s1815_s28 }
 0x7d9   : > { %v693_v18 = vpop.permute.xlu1 %692 }
 0x7da   : > { %v695_v19 = vmul.f32 %v1706_v10, %v693_v18 }
 0x7dc   : > { %702 = vrot.lane.b32.xlu0 %v695_v19, %s1814_s27 }
 0x7dd   : > { %v698_v20 = vpop.permute.xlu1 %697 }
 0x7de   : > { %700 = vst.msk [vmem:[#allocation4] sm:$0x1] %vm322_vm1, %v698_v20 }
 0x7e5   : > { %v1475_v21 = vld [vmem:[#allocation4] ss:$0 sm:$0xff] }
 0x7e6   : > { %803 = vrot.lane.b32.xlu1 %v1475_v21, %s1814_s27 }
 0x84e   : > { %v703_v22 = vpop.permute.xlu0 %702 }
 0x84f   : > { %705 = vst.msk [vmem:[#allocation3] sm:$0x1] %vm322_vm1, %v703_v22  ;;  %707 = vst.msk [vmem:[%s706_s12] sm:$0x1] %vm322_vm1, %v703_v22  ;;  %s1214_s12 = scalar_lea.vmem %s1979_s5, %s2121_s10 [#allocation5] }
 0x856   : > { %v711_v23 = vld [vmem:[#allocation3] sm:$0x1] }
 0x857   : > { %1594 = vmatmul.mubr.msk.f32.vlgmr.msra.gmra.mxu1 %vm334_vm3, %v711_v23 }
 0x858   : > { %1608 = vmatpush3.msra.mxu1 %v1914_v1  ;;  %1615 = vmatprep.mubr.msk.f32.mxu1 %vm1812_vm0, %v1811_v0  ;;  %v804_v35 = vpop.permute.xlu1 %803 }
 0x859   : > { %1609 = vmatprep.subr.mxu1 %v1811_v0 }
 0x85a   : > { %1610 = vmatpush3.msra.mxu1 %v1916_v2 }
 0x85b   : > { %1611 = vmatprep.subr.mxu1 %v1811_v0 }
 0x85c   : > { %1612 = vmatpush3.msra.mxu1 %v1920_v5 }
 0x85d   : > { %1613 = vmatprep.subr.mxu1 %v1811_v0 }
 0x85e   : > { %1614 = vmatpush3.msra.mxu1 %v1925_v7 }
 0x85f   : > { %1629 = vmatprep.subr.mxu1 %v1811_v0 }
 0x917   : > { %v785_v25 = vpop.f32.mrf.mxu1 }
 0x918   : > { %v789_v26 = vadd.f32 %v785_v25, %v710_v24 }
 0x919   : > { %v1595_v27 = vpop.f32.mrf.mxu1 }
 0x91a   : > { %1709 = vtanh.f32 %v789_v26  ;;  %v1474_v29 = vmul.f32 -1.442695, %v789_v26  ;;  %v1091_v26 = vld [vmem:[%s1090_s11] sm:$0x1] }
 0x91c   : > { %1711 = vpow2.f32 %v1474_v29 }
 0x927   : > { %v1710_v28 = vpop.eup %1709 }
 0x928   : > { %808 = vrot.lane.b32.xlu0 %v1710_v28, %s1813_s23 }
 0x929   : > { %v1712_v30 = vpop.eup %1711 }
 0x92a   : > { %v793_v31 = vadd.f32 1.0, %v1712_v30 }
 0x92c   : > { %1713 = vrcp.f32 %v793_v31 }
 0x939   : > { %v1714_v32 = vpop.eup %1713 }
 0x93a   : > { %v806_v36 = vmul.f32 %v1714_v32, %v804_v35 }
 0x99a   : > { %v809_v33 = vpop.permute.xlu0 %808 }
 0x99b   : > { %v811_v34 = vmul.f32 %v1714_v32, %v809_v33 }
 0x99d   : > { %813 = vrot.lane.b32.xlu0 %v811_v34, %s1814_s27 }
 0xa0f   : > { %v814_v37 = vpop.permute.xlu0 %813 }
 0xa10   : > { %v816_v38 = vadd.f32 %v814_v37, %v806_v36 }
 0xa12   : > { %1715 = vtanh.f32 %v816_v38 }
 0xa1f   : > { %v1716_v39 = vpop.eup %1715 }
 0xa20   : > { %819 = vrot.lane.b32.xlu1 %v1716_v39, %s1813_s23 }
 0xa24   : > { %824 = vrot.lane.b32.xlu1 %v816_v38, %s1815_s28 }
 0xa92   : > { %v820_v40 = vpop.permute.xlu1 %819 }
 0xa93   : > { %v822_v41 = vmul.f32 %v1714_v32, %v820_v40 }
 0xa95   : > { %829 = vrot.lane.b32.xlu0 %v822_v41, %s1814_s27 }
 0xa96   : > { %v825_v42 = vpop.permute.xlu1 %824 }
 0xa97   : > { %827 = vst.msk [vmem:[#allocation4] sm:$0x1] %vm322_vm1, %v825_v42 }
 0xa9e   : > { %v1478_v43 = vld [vmem:[#allocation4] ss:$0 sm:$0xff] }
 0xa9f   : > { %930 = vrot.lane.b32.xlu1 %v1478_v43, %s1814_s27 }
 0xb07   : > { %v830_v44 = vpop.permute.xlu0 %829 }
 0xb08   : > { %832 = vst.msk [vmem:[#allocation3] sm:$0x1] %vm322_vm1, %v830_v44  ;;  %834 = vst.msk [vmem:[%s833_s20] sm:$0x1] %vm322_vm1, %v830_v44  ;;  %s1489_s20 = sshll.u32 %s1863_s19, 7  ;;  %s1749_s19 = scalar_lea.vmem %s2156_s22, 128 }
 0xb09   : > { %p1750_p11 = scmp.ne.s32.totalorder %s2156_s22, %s1749_s19 }
 0xb0b   : > { %p1751_p12 = pnand %p1750_p11, %p1882_p5 }
 0xb0d   : > { %p1752_p13 = pneg %p1751_p12 }
 0xb0f   : > { %v838_v45 = vld [vmem:[#allocation3] sm:$0x1] }
 0xb10   : > { %1605 = vmatmul.mubr.msk.f32.vlgmr.msra.gmra.mxu0 %vm334_vm3, %v838_v45 }
 0xb11   : > { %1619 = vmatpush3.msra.mxu0 %v1914_v1  ;;  %1626 = vmatprep.mubr.msk.f32.mxu0 %vm1812_vm0, %v1811_v0  ;;  %v931_v57 = vpop.permute.xlu1 %930 }
 0xb12   : > { %1620 = vmatprep.subr.mxu0 %v1811_v0 }
 0xb13   : > { %1621 = vmatpush3.msra.mxu0 %v1916_v2 }
 0xb14   : > { %1622 = vmatprep.subr.mxu0 %v1811_v0 }
 0xb15   : > { %1623 = vmatpush3.msra.mxu0 %v1920_v5 }
 0xb16   : > { %1624 = vmatprep.subr.mxu0 %v1811_v0 }
 0xb17   : > { %1625 = vmatpush3.msra.mxu0 %v1925_v7 }
 0xbd0   : > { %v912_v47 = vpop.f32.mrf.mxu0 }
 0xbd1   : > { %v916_v48 = vadd.f32 %v912_v47, %v837_v46 }
 0xbd2   : > { %v1606_v49 = vpop.f32.mrf.mxu0 }
 0xbd3   : > { %1717 = vtanh.f32 %v916_v48  ;;  %v1477_v51 = vmul.f32 -1.442695, %v916_v48  ;;  %v1218_v48 = vld [vmem:[%s1217_s14] sm:$0x1] }
 0xbd5   : > { %1719 = vpow2.f32 %v1477_v51 }
 0xbe0   : > { %v1718_v50 = vpop.eup %1717 }
 0xbe1   : > { %935 = vrot.lane.b32.xlu0 %v1718_v50, %s1813_s23 }
 0xbe2   : > { %v1720_v52 = vpop.eup %1719 }
 0xbe3   : > { %v920_v53 = vadd.f32 1.0, %v1720_v52 }
 0xbe5   : > { %1721 = vrcp.f32 %v920_v53 }
 0xbf2   : > { %v1722_v54 = vpop.eup %1721 }
 0xbf3   : > { %v933_v58 = vmul.f32 %v1722_v54, %v931_v57 }
 0xc53   : > { %v936_v55 = vpop.permute.xlu0 %935 }
 0xc54   : > { %v938_v56 = vmul.f32 %v1722_v54, %v936_v55 }
 0xc56   : > { %940 = vrot.lane.b32.xlu0 %v938_v56, %s1814_s27 }
 0xcc8   : > { %v941_v59 = vpop.permute.xlu0 %940 }
 0xcc9   : > { %v943_v60 = vadd.f32 %v941_v59, %v933_v58 }
 0xccb   : > { %1723 = vtanh.f32 %v943_v60 }
 0xcd8   : > { %v1724_v61 = vpop.eup %1723 }
 0xcd9   : > { %946 = vrot.lane.b32.xlu1 %v1724_v61, %s1813_s23 }
 0xcdd   : > { %951 = vrot.lane.b32.xlu1 %v943_v60, %s1815_s28 }
 0xd4b   : > { %v947_v62 = vpop.permute.xlu1 %946 }
 0xd4c   : > { %v949_v63 = vmul.f32 %v1722_v54, %v947_v62 }
 0xd4e   : > { %956 = vrot.lane.b32.xlu0 %v949_v63, %s1814_s27 }
 0xd4f   : > { %v952_v3 = vpop.permute.xlu1 %951 }
 0xd50   : > { %954 = vst.msk [vmem:[#allocation4] sm:$0x1] %vm322_vm1, %v952_v3 }
 0xd57   : > { %v1481_v4 = vld [vmem:[#allocation4] ss:$0 sm:$0xff] }
 0xd58   : > { %1057 = vrot.lane.b32.xlu1 %v1481_v4, %s1814_s27 }
 0xdc0   : > { %v957_v6 = vpop.permute.xlu0 %956 }
 0xdc1   : > { %959 = vst.msk [vmem:[#allocation3] sm:$0x1] %vm322_vm1, %v957_v6  ;;  %961 = vst.msk [vmem:[%s960_s6] sm:$0x1] %vm322_vm1, %v957_v6 }
 0xdc8   : > { %v965_v8 = vld [vmem:[#allocation3] sm:$0x1] }
 0xdc9   : > { %1616 = vmatmul.mubr.msk.f32.vlgmr.msra.gmra.mxu1 %vm334_vm3, %v965_v8 }
 0xdca   : > { %1630 = vmatpush3.msra.mxu1 %v1914_v1  ;;  %1637 = vmatprep.mubr.msk.f32.mxu1 %vm1812_vm0, %v1811_v0  ;;  %v964_v1 = vld [vmem:[%s963_s8] sm:$0x1]  ;;  %v1058_v15 = vpop.permute.xlu1 %1057  ;;  %s2154_s8 = scalar_lea.hbm %s2203_s4, %s1489_s20 }
 0xdcb   : > { %1631 = vmatprep.subr.mxu1 %v1811_v0 }
 0xdcc   : > { %1632 = vmatpush3.msra.mxu1 %v1916_v2 }
 0xdcd   : > { %1633 = vmatprep.subr.mxu1 %v1811_v0 }
 0xdce   : > { %1634 = vmatpush3.msra.mxu1 %v1920_v5 }
 0xdcf   : > { %1635 = vmatprep.subr.mxu1 %v1811_v0 }
 0xdd0   : > { %1636 = vmatpush3.msra.mxu1 %v1925_v7 }
 0xe89   : > { %v1039_v9 = vpop.f32.mrf.mxu1 }
 0xe8a   : > { %v1043_v10 = vadd.f32 %v1039_v9, %v964_v1 }
 0xe8b   : > { %v1617_v11 = vpop.f32.mrf.mxu1 }
 0xe8c   : > { %1725 = vtanh.f32 %v1043_v10  ;;  %v1480_v2 = vmul.f32 -1.442695, %v1043_v10 }
 0xe8e   : > { %1727 = vpow2.f32 %v1480_v2 }
 0xe99   : > { %v1726_v12 = vpop.eup %1725 }
 0xe9a   : > { %1062 = vrot.lane.b32.xlu0 %v1726_v12, %s1813_s23 }
 0xe9b   : > { %v1728_v5 = vpop.eup %1727 }
 0xe9c   : > { %v1047_v13 = vadd.f32 1.0, %v1728_v5 }
 0xe9e   : > { %1729 = vrcp.f32 %v1047_v13 }
 0xeab   : > { %v1730_v0 = vpop.eup %1729 }
 0xeac   : > { %v1060_v16 = vmul.f32 %v1730_v0, %v1058_v15 }
 0xf0c   : > { %v1063_v7 = vpop.permute.xlu0 %1062 }
 0xf0d   : > { %v1065_v14 = vmul.f32 %v1730_v0, %v1063_v7 }
 0xf0f   : > { %1067 = vrot.lane.b32.xlu0 %v1065_v14, %s1814_s27 }
 0xf81   : > { %v1068_v17 = vpop.permute.xlu0 %1067 }
 0xf82   : > { %v1070_v18 = vadd.f32 %v1068_v17, %v1060_v16 }
 0xf84   : > { %1731 = vtanh.f32 %v1070_v18 }
 0xf91   : > { %v1732_v19 = vpop.eup %1731 }
 0xf92   : > { %1073 = vrot.lane.b32.xlu1 %v1732_v19, %s1813_s23 }
 0xf96   : > { %1078 = vrot.lane.b32.xlu1 %v1070_v18, %s1815_s28 }
0x1004   : > { %v1074_v20 = vpop.permute.xlu1 %1073 }
0x1005   : > { %v1076_v21 = vmul.f32 %v1730_v0, %v1074_v20 }
0x1007   : > { %1083 = vrot.lane.b32.xlu0 %v1076_v21, %s1814_s27 }
0x1008   : > { %v1079_v22 = vpop.permute.xlu1 %1078 }
0x1009   : > { %1081 = vst.msk [vmem:[#allocation4] sm:$0x1] %vm322_vm1, %v1079_v22 }
0x1010   : > { %v1484_v23 = vld [vmem:[#allocation4] ss:$0 sm:$0xff] }
0x1011   : > { %1184 = vrot.lane.b32.xlu1 %v1484_v23, %s1814_s27 }
0x1079   : > { %v1084_v24 = vpop.permute.xlu0 %1083 }
0x107a   : > { %1086 = vst.msk [vmem:[#allocation3] sm:$0x1] %vm322_vm1, %v1084_v24  ;;  %1088 = vst.msk [vmem:[%s1087_s9] sm:$0x1] %vm322_vm1, %v1084_v24 }
0x1081   : > { %v1092_v25 = vld [vmem:[#allocation3] sm:$0x1] }
0x1082   : > { %1627 = vmatmul.mubr.msk.f32.vlgmr.msra.gmra.mxu0 %vm334_vm3, %v1092_v25 }
0x1083   : > { %v1185_v37 = vpop.permute.xlu1 %1184 }
0x1142   : > { %v1166_v27 = vpop.f32.mrf.mxu0 }
0x1143   : > { %v1170_v28 = vadd.f32 %v1166_v27, %v1091_v26 }
0x1144   : > { %v1628_v29 = vpop.f32.mrf.mxu0 }
0x1145   : > { %1733 = vtanh.f32 %v1170_v28  ;;  %v1483_v31 = vmul.f32 -1.442695, %v1170_v28 }
0x1147   : > { %1735 = vpow2.f32 %v1483_v31 }
0x1152   : > { %v1734_v30 = vpop.eup %1733 }
0x1153   : > { %1189 = vrot.lane.b32.xlu0 %v1734_v30, %s1813_s23 }
0x1154   : > { %v1736_v32 = vpop.eup %1735 }
0x1155   : > { %v1174_v33 = vadd.f32 1.0, %v1736_v32 }
0x1157   : > { %1737 = vrcp.f32 %v1174_v33 }
0x1164   : > { %v1738_v34 = vpop.eup %1737 }
0x1165   : > { %v1187_v38 = vmul.f32 %v1738_v34, %v1185_v37 }
0x11c5   : > { %v1190_v35 = vpop.permute.xlu0 %1189 }
0x11c6   : > { %v1192_v36 = vmul.f32 %v1738_v34, %v1190_v35 }
0x11c8   : > { %1194 = vrot.lane.b32.xlu0 %v1192_v36, %s1814_s27 }
0x123a   : > { %v1195_v39 = vpop.permute.xlu0 %1194 }
0x123b   : > { %v1197_v40 = vadd.f32 %v1195_v39, %v1187_v38 }
0x123d   : > { %1739 = vtanh.f32 %v1197_v40 }
0x124a   : > { %v1740_v41 = vpop.eup %1739 }
0x124b   : > { %1200 = vrot.lane.b32.xlu1 %v1740_v41, %s1813_s23 }
0x124f   : > { %1205 = vrot.lane.b32.xlu1 %v1197_v40, %s1815_s28 }
0x12bd   : > { %v1201_v42 = vpop.permute.xlu1 %1200 }
0x12be   : > { %v1203_v43 = vmul.f32 %v1738_v34, %v1201_v42 }
0x12c0   : > { %1210 = vrot.lane.b32.xlu0 %v1203_v43, %s1814_s27 }
0x12c1   : > { %v1206_v44 = vpop.permute.xlu1 %1205 }
0x12c2   : > { %1208 = vst.msk [vmem:[#allocation4] sm:$0x1] %vm322_vm1, %v1206_v44 }
0x12c9   : > { %v1487_v45 = vld [vmem:[#allocation4] ss:$0 sm:$0xff] }
0x12ca   : > { %1311 = vrot.lane.b32.xlu1 %v1487_v45, %s1814_s27 }
0x1332   : > { %v1211_v46 = vpop.permute.xlu0 %1210 }
0x1333   : > { %1213 = vst.msk [vmem:[#allocation3] sm:$0x1] %vm322_vm1, %v1211_v46  ;;  %1215 = vst.msk [vmem:[%s1214_s12] sm:$0x1] %vm322_vm1, %v1211_v46 }
0x133a   : > { %v1219_v47 = vld [vmem:[#allocation3] sm:$0x1] }
0x133b   : > { %1638 = vmatmul.mubr.msk.f32.vlgmr.msra.gmra.mxu1 %vm334_vm3, %v1219_v47 }
0x133c   : > { %v1312_v59 = vpop.permute.xlu1 %1311 }
0x13fb   : > { %v1293_v49 = vpop.f32.mrf.mxu1 }
0x13fc   : > { %v1297_v50 = vadd.f32 %v1293_v49, %v1218_v48 }
0x13fd   : > { %v1639_v51 = vpop.f32.mrf.mxu1 }
0x13fe   : > { %1741 = vtanh.f32 %v1297_v50  ;;  %v1486_v53 = vmul.f32 -1.442695, %v1297_v50 }
0x1400   : > { %1743 = vpow2.f32 %v1486_v53 }
0x140b   : > { %v1742_v52 = vpop.eup %1741 }
0x140c   : > { %1316 = vrot.lane.b32.xlu0 %v1742_v52, %s1813_s23 }
0x140d   : > { %v1744_v54 = vpop.eup %1743 }
0x140e   : > { %v1301_v55 = vadd.f32 1.0, %v1744_v54 }
0x1410   : > { %1745 = vrcp.f32 %v1301_v55 }
0x141d   : > { %v1746_v56 = vpop.eup %1745 }
0x141e   : > { %v1314_v60 = vmul.f32 %v1746_v56, %v1312_v59 }
0x147e   : > { %v1317_v57 = vpop.permute.xlu0 %1316 }
0x147f   : > { %v1319_v58 = vmul.f32 %v1746_v56, %v1317_v57 }
0x1481   : > { %1321 = vrot.lane.b32.xlu0 %v1319_v58, %s1814_s27 }
0x14f3   : > { %v1322_v61 = vpop.permute.xlu0 %1321 }
0x14f4   : > { %v1324_v62 = vadd.f32 %v1322_v61, %v1314_v60 }
0x14f6   : > { %1747 = vtanh.f32 %v1324_v62 }
0x1503   : > { %v1748_v63 = vpop.eup %1747 }
0x1504   : > { %1327 = vrot.lane.b32.xlu1 %v1748_v63, %s1813_s23  ;;  %s1344_s23 = scalar_lea.sflag [#allocation6], %s214_s29 }
0x1508   : > { %1332 = vrot.lane.b32.xlu1 %v1324_v62, %s1815_s28 }
0x1576   : > { %v1328_v3 = vpop.permute.xlu1 %1327 }
0x1577   : > { %v1330_v4 = vmul.f32 %v1746_v56, %v1328_v3 }
0x1579   : > { %1337 = vrot.lane.b32.xlu0 %v1330_v4, %s1814_s27  ;;  %s1816_s27 = smov [#allocation5]  }
0x157a   : > { %v1333_v6 = vpop.permute.xlu1 %1332  ;;  %s1753_s28 = sshll.u32 %s1816_s27, 4  ;;  %s1754_s28 = int_to_ptr.vmem [resolvable:$false] %s1753_s28 }
0x157b   : > { %1335 = vst.msk [vmem:[#allocation4] sm:$0x1] %vm322_vm1, %v1333_v6  ;;  %s1755_s5 = scalar_lea.vmem %s1754_s28, 256  ;;  %p1756_p0 = scmp.lt.s32.totalorder %s2156_s22, %s1754_s28 }
0x157c   : > { %p1757_p1 = scmp.lt.s32.totalorder %s1755_s5, %s1749_s19 }
0x157e   : > { %p1758_p2 = por %p1757_p1, %p1756_p0 }
0x1580   : > { %p1759_p3 = pnand %p1758_p2, %p1752_p13 }
0x15eb   : > { %v1338_v8 = vpop.permute.xlu0 %1337 }
0x15ec   : > { %1340 = vst.msk [vmem:[#allocation3] sm:$0x1] %vm322_vm1, %v1338_v8  ;;  %1342 = vst.msk [vmem:[%s1341_s30] sm:$0x1] %vm322_vm1, %v1338_v8 }
0x15ed   : > { %1762 = shalt.err (!%p1759_p3)
}
0x15ee   : > { %s1763_s9 = scalar_lea.hbm %s2154_s8, 128  ;;  %s1767_s11 = scalar_lea.hbm %s2203_s4, 256 }
0x15ef   : > { %p1764_p4 = scmp.ne.s32.totalorder %s2154_s8, %s1763_s9  ;;  %p1768_p9 = scmp.lt.s32.totalorder %s2154_s8, %s2203_s4 }
0x15f0   : > { %p1769_p10 = scmp.lt.s32.totalorder %s1767_s11, %s1763_s9 }
0x15f1   : > { %p1765_p7 = pnand %p1764_p4, %p1882_p5 }
0x15f2   : > { %p1770_p11 = por %p1769_p10, %p1768_p9 }
0x15f3   : > { %p1766_p8 = pneg %p1765_p7 }
0x15f5   : > { %p1771_p12 = pnand %p1770_p11, %p1766_p8 }
0x15f7   : > { %1774 = shalt.err (!%p1771_p12)
}
0x15f8   : > { %1641 = dma.vmem_to_hbm [thread:$0]  (%p1882_p5), %s2156_s22, 128, %s2154_s8, %s1344_s23  }
0x15f9 PF: > { %p1647_p13 = scmp.ge.s32.totalorder %s1809_s18, 2  ;;  %s1369_s14 = sand.u32 1, %s1797_s15  }
0x15fa   : > { %s1370_s20 = scalar_lea.sflag [#allocation6], %s1369_s14 }
0x15fb   : > { %p1644_p0 = pnand %p1647_p13, %p1886_p6 }
0x15fd   : > { %p1645_p1 = pneg %p1644_p0 }
0x15ff   : > { %1792 = dma.done.wait (%p1645_p1), %s1370_s20, 128  }
0x1600   : > { %1794 = vsyncadd (%p1645_p1), %s1370_s20, 4294967168  ;;  %p14_p2 = scmp.ge.s32.totalorder %s1867_s21, 4   ;;  %s2206_s15 = smov %s1801_s16 }
0x1601   : > { %s2207_s16 = smov %s1805_s17  ;;  %s2208_s17 = smov %s1878_s24 }
0x1602   : > { %s2209_s18 = smov %s1867_s21  ;;  %16 = sbr.rel (!%p14_p2) target bundleno = 3 (0x3), region = 93 }
0x1607   :  { %1375 = vsyncpa [#allocation6], 1 }
0x1608   :  { %1377 = vsyncpa [#allocation6 + $0x1], 1 }

</bundles_post_ra>
